<compile_context>
chip_gen: v5e
topology: v5e:2x2
jax: 0.10.0
libtpu: 0.0.40
codegen_flags: <defaults>
</compile_context>

<pallas_src>
import functools

import jax
import jax.numpy as jnp
from jax import lax
from jax.experimental import pallas as pl
from jax.experimental.pallas import tpu as pltpu


def _round_up(x, m):
    return ((x + m - 1) // m) * m


def _pilotnet_kernel(x_ref, wc_ref, const_ref, wl_ref, bl_ref, o_ref, xa_ref,
                     *, wp, front, s_cols):
    """One grid step == NB images (whole forward for each of them).

    x_ref     : (NB, Cin_p, S_tot) bf16  padded images, flat spatial on lanes
    wc_ref    : (Cout, K_pad)      bf16  conv*BNscale | BN-bias col | 1.0 col | 0
    const_ref : (K_const, S_cols)  bf16  [ones row, penalty row, zeros, zeros]
    wl_ref    : (Cout, out_ch)     f32   linear weight^T, pre-scaled by 1/(H*W)
    bl_ref    : (1, out_ch)        f32   linear bias
    o_ref     : (NB, out_ch)       f32   per-image outputs for this step
    xa_ref    : (K_pad, S_cols)    bf16  VMEM scratch: fused im2col chunk
    """
    nb = o_ref.shape[0]
    cin_p = x_ref.shape[1]
    n_tap_rows = 9 * cin_p

    # Constant rows (bias "ones", ReLU penalty, zero pads): once per grid step,
    # freshly written (no stale-VMEM NaN hazard, megacore-safe), amortized
    # over the NB images below.
    xa_ref[n_tap_rows:, :] = const_ref[...]

    rows = []
    for b in range(nb):                      # static unroll: NB is small
        # --- assemble the fused im2col chunk: 9 statically shifted slices ---
        t = 0
        for dy in (-1, 0, 1):
            for dx in (-1, 0, 1):
                start = front + dy * wp + dx            # static Python int
                xa_ref[cin_p * t:cin_p * (t + 1), :] = (
                    x_ref[b, :, start:start + s_cols])
                t += 1

        # --- Conv3x3 + BN(eval) + interior-mask penalty: ONE MXU matmul ---
        y = jnp.dot(wc_ref[...], xa_ref[...],
                    preferred_element_type=jnp.float32)  # (Cout, S_cols) f32
        y = jnp.maximum(y, 0.0)       # ReLU; penalty row already killed seams

        # --- AdaptiveAvgPool2d((1,1)): lane-sum (1/(H*W) folded into wl) ---
        pooled = jnp.sum(y, axis=1, keepdims=True)       # (Cout, 1)

        # --- Linear head for this image ---
        rows.append(jnp.sum(pooled * wl_ref[...], axis=0, keepdims=True)
                    + bl_ref[...])                       # (1, out_ch)

    o_ref[...] = jnp.concatenate(rows, axis=0).astype(o_ref.dtype)


def pilotnet_forward(x_nchw, params, *, nb=4):
    N, Cin, H, W = x_nchw.shape
    conv_w = params["conv_w"]                      # (Cout, Cin, 3, 3) OIHW
    Cout = conv_w.shape[0]
    lin_w = params["lin_w"]                        # (out_ch, Cout)
    out_ch = lin_w.shape[0]

    nb = max(1, min(nb, N))                        # images per grid step
    n_pad = _round_up(N, nb)
    G = n_pad // nb

    cin_p = _round_up(Cin, 4)                      # aligned bf16 tap groups
    Hp, Wp = H + 2, W + 2                          # conv padding = 1
    s_real = Hp * Wp
    d_max = Wp + 1                                 # largest |tap shift|
    s_cols = _round_up(s_real, 128)                # matmul width (lane axis)
    front = _round_up(d_max, 128)                  # so every slice start >= 0
    s_tot = _round_up(front + d_max + s_cols, 128)

    k_taps = 9 * cin_p
    k_const = 4                                    # ones | penalty | 0 | 0
    k_pad = k_taps + k_const

    # ---- input: channel-major (padded to cin_p), flat padded spatial on lanes ----
    xf = x_nchw.astype(jnp.float32)
    xf = jnp.pad(xf, ((0, n_pad - N), (0, cin_p - Cin), (1, 1), (1, 1)))
    xf = xf.reshape(n_pad, cin_p, s_real)
    xf = jnp.pad(xf, ((0, 0), (0, 0), (front, s_tot - front - s_real)))
    xf = xf.astype(jnp.bfloat16)

    # ---- fold BatchNorm (running stats) into conv weights + a bias column ----
    inv = 1.0 / jnp.sqrt(params["bn_var"] + params["bn_eps"])
    scale = params["bn_gamma"] * inv                            # (Cout,)
    bias = params["bn_beta"] - params["bn_mean"] * scale        # (Cout,)
    # column (ky*3+kx)*cin_p + ci  <->  xa row cin_p*t + ci (kernel tap order)
    w_tap = jnp.transpose(conv_w, (0, 2, 3, 1))                 # (Cout,3,3,Cin)
    w_tap = jnp.pad(w_tap, ((0, 0), (0, 0), (0, 0), (0, cin_p - Cin)))
    w_tap = w_tap.reshape(Cout, k_taps).astype(jnp.float32)
    w_aug = jnp.concatenate(
        [w_tap * scale[:, None],                # taps, BN scale folded in
         bias[:, None],                         # pairs with the "ones" row
         jnp.ones((Cout, 1), jnp.float32),      # pairs with the penalty row
         jnp.zeros((Cout, k_const - 2), jnp.float32)], axis=1)  # (Cout, k_pad)
    w_aug = w_aug.astype(jnp.bfloat16)

    # ---- constant K-rows: ones (bias) + penalty (-1e30 on non-interior) ----
    j = jnp.arange(s_cols)
    hp_i, wp_i = j // Wp, j % Wp
    interior = (hp_i >= 1) & (hp_i <= H) & (wp_i >= 1) & (wp_i <= W)
    const_rows = jnp.concatenate(
        [jnp.ones((1, s_cols), jnp.float32),
         jnp.where(interior, 0.0, -1e30).reshape(1, s_cols),
         jnp.zeros((k_const - 2, s_cols), jnp.float32)], axis=0)
    const_rows = const_rows.astype(jnp.bfloat16)                # (k_const, s_cols)

    wl_t = (lin_w.T / float(H * W)).astype(jnp.float32)         # (Cout, out_ch)
    bl = params["lin_b"].reshape(1, out_ch).astype(jnp.float32)

    kernel = functools.partial(_pilotnet_kernel, wp=Wp, front=front,
                               s_cols=s_cols)

    out3 = pl.pallas_call(
        kernel,
        out_shape=jax.ShapeDtypeStruct((G, nb, out_ch), jnp.float32),
        grid=(G,),
        in_specs=[
            pl.BlockSpec((nb, cin_p, s_tot), lambda g: (g, 0, 0)),  # NB images
            pl.BlockSpec((Cout, k_pad), lambda g: (0, 0)),          # conv+BN w
            pl.BlockSpec((k_const, s_cols), lambda g: (0, 0)),      # const rows
            pl.BlockSpec((Cout, out_ch), lambda g: (0, 0)),         # linear w
            pl.BlockSpec((1, out_ch), lambda g: (0, 0)),            # linear b
        ],
        out_specs=pl.BlockSpec((None, nb, out_ch), lambda g: (g, 0, 0)),
        scratch_shapes=[pltpu.VMEM((k_pad, s_cols), jnp.bfloat16)],
        compiler_params=pltpu.CompilerParams(
            dimension_semantics=("parallel",),      # batch axis -> megacore
            # footprint here is tiny; raise toward 48-64 MiB (v5e/v6e) for
            # 66x200 frames with NB up to ~16, keep <= ~40 MiB on v7x.
            vmem_limit_bytes=32 * 1024 * 1024),
    )(xf, w_aug, const_rows, wl_t, bl)
    return out3.reshape(n_pad, out_ch)[:N]


def pilotnet_ref(x_nchw, params):
    """Pure-JAX f32 reference (matches PyTorch eval-mode forward)."""
    y = lax.conv_general_dilated(
        x_nchw, params["conv_w"], window_strides=(1, 1),
        padding=((1, 1), (1, 1)),
        dimension_numbers=("NCHW", "OIHW", "NCHW"))
    inv = 1.0 / jnp.sqrt(params["bn_var"] + params["bn_eps"])
    y = ((y - params["bn_mean"][None, :, None, None])
         * (params["bn_gamma"] * inv)[None, :, None, None]
         + params["bn_beta"][None, :, None, None])
    y = jnp.maximum(y, 0.0)
    pooled = jnp.mean(y, axis=(2, 3))
    return pooled @ params["lin_w"].T + params["lin_b"][None, :]


def init_params(key, in_channels=3, out_channels=1, conv_channels=32):
    ks = jax.random.split(key, 6)
    return {
        "conv_w": 0.1 * jax.random.normal(
            ks[0], (conv_channels, in_channels, 3, 3), jnp.float32),
        "bn_gamma": 1.0 + 0.1 * jax.random.normal(ks[1], (conv_channels,), jnp.float32),
        "bn_beta": 0.1 * jax.random.normal(ks[2], (conv_channels,), jnp.float32),
        "bn_mean": 0.1 * jax.random.normal(ks[3], (conv_channels,), jnp.float32),
        "bn_var": 0.5 + jax.random.uniform(ks[4], (conv_channels,), jnp.float32),
        "bn_eps": jnp.float32(1e-5),
        "lin_w": 0.1 * jax.random.normal(ks[5], (out_channels, conv_channels), jnp.float32),
        "lin_b": jnp.zeros((out_channels,), jnp.float32),
    }


if __name__ == "__main__":
    key = jax.random.PRNGKey(0)
    pkey, xkey = jax.random.split(key)

    # Small shapes consistent with PilotNet defaults; N=8 with NB=4 exercises
    # the multi-image-per-step path and a grid of length 2 (megacore-shardable).
    N, Cin, H, W = 8, 3, 16, 16
    out_channels = 1

    params = init_params(pkey, in_channels=Cin, out_channels=out_channels)
    x = jax.random.normal(xkey, (N, Cin, H, W), jnp.float32)

    out = pilotnet_forward(x, params, nb=4)
    out = jax.block_until_ready(out)

    ref = pilotnet_ref(x, params)
    assert out.shape == (N, out_channels)
    # bf16 conv path vs f32 reference -> loosen tolerance accordingly.
    assert jnp.allclose(out, ref, atol=2e-2, rtol=2e-2), (out, ref)

    print("KERNEL_OK")
</pallas_src>

<mosaic_0001>
module attributes {stable_mosaic.version = 11 : i64} {
  func.func @_pilotnet_kernel(%arg0: i32, %arg1: memref<4x4x640xbf16, #tpu.memory_space<vmem>>, %arg2: memref<32x40xbf16, #tpu.memory_space<vmem>>, %arg3: memref<4x384xbf16, #tpu.memory_space<vmem>>, %arg4: memref<32x1xf32, #tpu.memory_space<vmem>>, %arg5: memref<1x1xf32, #tpu.memory_space<vmem>>, %arg6: memref<1x4x1xf32, #tpu.memory_space<vmem>>, %arg7: memref<40x384xbf16, #tpu.memory_space<vmem>>) attributes {dimension_semantics = [#tpu.dimension_semantics<parallel>], iteration_bounds = array<i64: 2>, scalar_prefetch = 0 : i64, scratch_operands = 1 : i64, tpu.core_type = #tpu.core_type<tc>, window_params = [{transform_indices = @transform_0, window_bounds = array<i64: 4, 4, 640>}, {pipeline_mode = #tpu.pipeline_mode<synchronous>, transform_indices = @transform_1, window_bounds = array<i64: 32, 40>}, {pipeline_mode = #tpu.pipeline_mode<synchronous>, transform_indices = @transform_2, window_bounds = array<i64: 4, 384>}, {pipeline_mode = #tpu.pipeline_mode<synchronous>, transform_indices = @transform_3, window_bounds = array<i64: 32, 1>}, {pipeline_mode = #tpu.pipeline_mode<synchronous>, transform_indices = @transform_4, window_bounds = array<i64: 1, 1>}, {transform_indices = @transform_5, window_bounds = array<i64: 1, 4, 1>}]} {
    %c0 = arith.constant 0 : index
    %c0_0 = arith.constant 0 : index
    %0 = vector.load %arg3[%c0, %c0_0] : memref<4x384xbf16, #tpu.memory_space<vmem>>, vector<4x384xbf16>
    %c36 = arith.constant 36 : index
    %c0_1 = arith.constant 0 : index
    %1 = vector.load %arg7[%c36, %c0_1] : memref<40x384xbf16, #tpu.memory_space<vmem>>, vector<4x384xbf16>
    tpu.vector_store %arg7[%c36, %c0_1], %0 {strides = array<i32>} : memref<40x384xbf16, #tpu.memory_space<vmem>>, vector<4x384xbf16>,
    %c0_2 = arith.constant 0 : index
    %c0_3 = arith.constant 0 : index
    %c109 = arith.constant 109 : index
    %2 = vector.load %arg1[%c0_2, %c0_3, %c109] : memref<4x4x640xbf16, #tpu.memory_space<vmem>>, vector<1x4x384xbf16>
    %3 = vector.shape_cast %2 : vector<1x4x384xbf16> to vector<4x384xbf16>
    %c0_4 = arith.constant 0 : index
    %c0_5 = arith.constant 0 : index
    %4 = vector.load %arg7[%c0_4, %c0_5] : memref<40x384xbf16, #tpu.memory_space<vmem>>, vector<4x384xbf16>
    tpu.vector_store %arg7[%c0_4, %c0_5], %3 {strides = array<i32>} : memref<40x384xbf16, #tpu.memory_space<vmem>>, vector<4x384xbf16>,
    %c0_6 = arith.constant 0 : index
    %c0_7 = arith.constant 0 : index
    %c110 = arith.constant 110 : index
    %5 = vector.load %arg1[%c0_6, %c0_7, %c110] : memref<4x4x640xbf16, #tpu.memory_space<vmem>>, vector<1x4x384xbf16>
    %6 = vector.shape_cast %5 : vector<1x4x384xbf16> to vector<4x384xbf16>
    %c4 = arith.constant 4 : index
    %c0_8 = arith.constant 0 : index
    %7 = vector.load %arg7[%c4, %c0_8] : memref<40x384xbf16, #tpu.memory_space<vmem>>, vector<4x384xbf16>
    tpu.vector_store %arg7[%c4, %c0_8], %6 {strides = array<i32>} : memref<40x384xbf16, #tpu.memory_space<vmem>>, vector<4x384xbf16>,
    %c0_9 = arith.constant 0 : index
    %c0_10 = arith.constant 0 : index
    %c111 = arith.constant 111 : index
    %8 = vector.load %arg1[%c0_9, %c0_10, %c111] : memref<4x4x640xbf16, #tpu.memory_space<vmem>>, vector<1x4x384xbf16>
    %9 = vector.shape_cast %8 : vector<1x4x384xbf16> to vector<4x384xbf16>
    %c8 = arith.constant 8 : index
    %c0_11 = arith.constant 0 : index
    %10 = vector.load %arg7[%c8, %c0_11] : memref<40x384xbf16, #tpu.memory_space<vmem>>, vector<4x384xbf16>
    tpu.vector_store %arg7[%c8, %c0_11], %9 {strides = array<i32>} : memref<40x384xbf16, #tpu.memory_space<vmem>>, vector<4x384xbf16>,
    %c0_12 = arith.constant 0 : index
    %c0_13 = arith.constant 0 : index
    %c127 = arith.constant 127 : index
    %11 = vector.load %arg1[%c0_12, %c0_13, %c127] : memref<4x4x640xbf16, #tpu.memory_space<vmem>>, vector<1x4x384xbf16>
    %12 = vector.shape_cast %11 : vector<1x4x384xbf16> to vector<4x384xbf16>
    %c12 = arith.constant 12 : index
    %c0_14 = arith.constant 0 : index
    %13 = vector.load %arg7[%c12, %c0_14] : memref<40x384xbf16, #tpu.memory_space<vmem>>, vector<4x384xbf16>
    tpu.vector_store %arg7[%c12, %c0_14], %12 {strides = array<i32>} : memref<40x384xbf16, #tpu.memory_space<vmem>>, vector<4x384xbf16>,
    %c0_15 = arith.constant 0 : index
    %c0_16 = arith.constant 0 : index
    %c128 = arith.constant 128 : index
    %14 = vector.load %arg1[%c0_15, %c0_16, %c128] : memref<4x4x640xbf16, #tpu.memory_space<vmem>>, vector<1x4x384xbf16>
    %15 = vector.shape_cast %14 : vector<1x4x384xbf16> to vector<4x384xbf16>
    %c16 = arith.constant 16 : index
    %c0_17 = arith.constant 0 : index
    %16 = vector.load %arg7[%c16, %c0_17] : memref<40x384xbf16, #tpu.memory_space<vmem>>, vector<4x384xbf16>
    tpu.vector_store %arg7[%c16, %c0_17], %15 {strides = array<i32>} : memref<40x384xbf16, #tpu.memory_space<vmem>>, vector<4x384xbf16>,
    %c0_18 = arith.constant 0 : index
    %c0_19 = arith.constant 0 : index
    %c129 = arith.constant 129 : index
    %17 = vector.load %arg1[%c0_18, %c0_19, %c129] : memref<4x4x640xbf16, #tpu.memory_space<vmem>>, vector<1x4x384xbf16>
    %18 = vector.shape_cast %17 : vector<1x4x384xbf16> to vector<4x384xbf16>
    %c20 = arith.constant 20 : index
    %c0_20 = arith.constant 0 : index
    %19 = vector.load %arg7[%c20, %c0_20] : memref<40x384xbf16, #tpu.memory_space<vmem>>, vector<4x384xbf16>
    tpu.vector_store %arg7[%c20, %c0_20], %18 {strides = array<i32>} : memref<40x384xbf16, #tpu.memory_space<vmem>>, vector<4x384xbf16>,
    %c0_21 = arith.constant 0 : index
    %c0_22 = arith.constant 0 : index
    %c145 = arith.constant 145 : index
    %20 = vector.load %arg1[%c0_21, %c0_22, %c145] : memref<4x4x640xbf16, #tpu.memory_space<vmem>>, vector<1x4x384xbf16>
    %21 = vector.shape_cast %20 : vector<1x4x384xbf16> to vector<4x384xbf16>
    %c24 = arith.constant 24 : index
    %c0_23 = arith.constant 0 : index
    %22 = vector.load %arg7[%c24, %c0_23] : memref<40x384xbf16, #tpu.memory_space<vmem>>, vector<4x384xbf16>
    tpu.vector_store %arg7[%c24, %c0_23], %21 {strides = array<i32>} : memref<40x384xbf16, #tpu.memory_space<vmem>>, vector<4x384xbf16>,
    %c0_24 = arith.constant 0 : index
    %c0_25 = arith.constant 0 : index
    %c146 = arith.constant 146 : index
    %23 = vector.load %arg1[%c0_24, %c0_25, %c146] : memref<4x4x640xbf16, #tpu.memory_space<vmem>>, vector<1x4x384xbf16>
    %24 = vector.shape_cast %23 : vector<1x4x384xbf16> to vector<4x384xbf16>
    %c28 = arith.constant 28 : index
    %c0_26 = arith.constant 0 : index
    %25 = vector.load %arg7[%c28, %c0_26] : memref<40x384xbf16, #tpu.memory_space<vmem>>, vector<4x384xbf16>
    tpu.vector_store %arg7[%c28, %c0_26], %24 {strides = array<i32>} : memref<40x384xbf16, #tpu.memory_space<vmem>>, vector<4x384xbf16>,
    %c0_27 = arith.constant 0 : index
    %c0_28 = arith.constant 0 : index
    %c147 = arith.constant 147 : index
    %26 = vector.load %arg1[%c0_27, %c0_28, %c147] : memref<4x4x640xbf16, #tpu.memory_space<vmem>>, vector<1x4x384xbf16>
    %27 = vector.shape_cast %26 : vector<1x4x384xbf16> to vector<4x384xbf16>
    %c32 = arith.constant 32 : index
    %c0_29 = arith.constant 0 : index
    %28 = vector.load %arg7[%c32, %c0_29] : memref<40x384xbf16, #tpu.memory_space<vmem>>, vector<4x384xbf16>
    tpu.vector_store %arg7[%c32, %c0_29], %27 {strides = array<i32>} : memref<40x384xbf16, #tpu.memory_space<vmem>>, vector<4x384xbf16>,
    %c0_30 = arith.constant 0 : index
    %c0_31 = arith.constant 0 : index
    %29 = vector.load %arg2[%c0_30, %c0_31] : memref<32x40xbf16, #tpu.memory_space<vmem>>, vector<32x40xbf16>
    %c0_32 = arith.constant 0 : index
    %c0_33 = arith.constant 0 : index
    %30 = vector.load %arg7[%c0_32, %c0_33] : memref<40x384xbf16, #tpu.memory_space<vmem>>, vector<40x384xbf16>
    %cst = arith.constant dense<0.000000e+00> : vector<32x384xf32>
    %31 = tpu.matmul %29, %30, %cst {dimension_numbers = #tpu.dot_dimension_numbers<[1], [0], [0], [1], [0, 0, 1, 1], [], []>} : vector<32x40xbf16>, vector<40x384xbf16>, vector<32x384xf32> -> vector<32x384xf32>
    %cst_34 = arith.constant 0.000000e+00 : f32
    %32 = vector.broadcast %cst_34 : f32 to vector<32x384xf32>
    %33 = arith.maximumf %31, %32 : vector<32x384xf32>
    %cst_35 = arith.constant dense<0.000000e+00> : vector<32xf32>
    %34 = vector.multi_reduction <add>, %33, %cst_35 [1] : vector<32x384xf32> to vector<32xf32>
    %35 = vector.shape_cast %34 : vector<32xf32> to vector<32x1xf32>
    %c0_36 = arith.constant 0 : index
    %c0_37 = arith.constant 0 : index
    %36 = vector.load %arg4[%c0_36, %c0_37] : memref<32x1xf32, #tpu.memory_space<vmem>>, vector<32x1xf32>
    %37 = arith.mulf %35, %36 : vector<32x1xf32>
    %cst_38 = arith.constant dense<0.000000e+00> : vector<1xf32>
    %38 = vector.multi_reduction <add>, %37, %cst_38 [0] : vector<32x1xf32> to vector<1xf32>
    %39 = vector.shape_cast %38 : vector<1xf32> to vector<1x1xf32>
    %c0_39 = arith.constant 0 : index
    %c0_40 = arith.constant 0 : index
    %40 = vector.load %arg5[%c0_39, %c0_40] : memref<1x1xf32, #tpu.memory_space<vmem>>, vector<1x1xf32>
    %41 = arith.addf %39, %40 : vector<1x1xf32>
    %c1 = arith.constant 1 : index
    %c0_41 = arith.constant 0 : index
    %c109_42 = arith.constant 109 : index
    %42 = vector.load %arg1[%c1, %c0_41, %c109_42] : memref<4x4x640xbf16, #tpu.memory_space<vmem>>, vector<1x4x384xbf16>
    %43 = vector.shape_cast %42 : vector<1x4x384xbf16> to vector<4x384xbf16>
    %c0_43 = arith.constant 0 : index
    %c0_44 = arith.constant 0 : index
    %44 = vector.load %arg7[%c0_43, %c0_44] : memref<40x384xbf16, #tpu.memory_space<vmem>>, vector<4x384xbf16>
    tpu.vector_store %arg7[%c0_43, %c0_44], %43 {strides = array<i32>} : memref<40x384xbf16, #tpu.memory_space<vmem>>, vector<4x384xbf16>,
    %c1_45 = arith.constant 1 : index
    %c0_46 = arith.constant 0 : index
    %c110_47 = arith.constant 110 : index
    %45 = vector.load %arg1[%c1_45, %c0_46, %c110_47] : memref<4x4x640xbf16, #tpu.memory_space<vmem>>, vector<1x4x384xbf16>
    %46 = vector.shape_cast %45 : vector<1x4x384xbf16> to vector<4x384xbf16>
    %c4_48 = arith.constant 4 : index
    %c0_49 = arith.constant 0 : index
    %47 = vector.load %arg7[%c4_48, %c0_49] : memref<40x384xbf16, #tpu.memory_space<vmem>>, vector<4x384xbf16>
    tpu.vector_store %arg7[%c4_48, %c0_49], %46 {strides = array<i32>} : memref<40x384xbf16, #tpu.memory_space<vmem>>, vector<4x384xbf16>,
    %c1_50 = arith.constant 1 : index
    %c0_51 = arith.constant 0 : index
    %c111_52 = arith.constant 111 : index
    %48 = vector.load %arg1[%c1_50, %c0_51, %c111_52] : memref<4x4x640xbf16, #tpu.memory_space<vmem>>, vector<1x4x384xbf16>
    %49 = vector.shape_cast %48 : vector<1x4x384xbf16> to vector<4x384xbf16>
    %c8_53 = arith.constant 8 : index
    %c0_54 = arith.constant 0 : index
    %50 = vector.load %arg7[%c8_53, %c0_54] : memref<40x384xbf16, #tpu.memory_space<vmem>>, vector<4x384xbf16>
    tpu.vector_store %arg7[%c8_53, %c0_54], %49 {strides = array<i32>} : memref<40x384xbf16, #tpu.memory_space<vmem>>, vector<4x384xbf16>,
    %c1_55 = arith.constant 1 : index
    %c0_56 = arith.constant 0 : index
    %c127_57 = arith.constant 127 : index
    %51 = vector.load %arg1[%c1_55, %c0_56, %c127_57] : memref<4x4x640xbf16, #tpu.memory_space<vmem>>, vector<1x4x384xbf16>
    %52 = vector.shape_cast %51 : vector<1x4x384xbf16> to vector<4x384xbf16>
    %c12_58 = arith.constant 12 : index
    %c0_59 = arith.constant 0 : index
    %53 = vector.load %arg7[%c12_58, %c0_59] : memref<40x384xbf16, #tpu.memory_space<vmem>>, vector<4x384xbf16>
    tpu.vector_store %arg7[%c12_58, %c0_59], %52 {strides = array<i32>} : memref<40x384xbf16, #tpu.memory_space<vmem>>, vector<4x384xbf16>,
    %c1_60 = arith.constant 1 : index
    %c0_61 = arith.constant 0 : index
    %c128_62 = arith.constant 128 : index
    %54 = vector.load %arg1[%c1_60, %c0_61, %c128_62] : memref<4x4x640xbf16, #tpu.memory_space<vmem>>, vector<1x4x384xbf16>
    %55 = vector.shape_cast %54 : vector<1x4x384xbf16> to vector<4x384xbf16>
    %c16_63 = arith.constant 16 : index
    %c0_64 = arith.constant 0 : index
    %56 = vector.load %arg7[%c16_63, %c0_64] : memref<40x384xbf16, #tpu.memory_space<vmem>>, vector<4x384xbf16>
    tpu.vector_store %arg7[%c16_63, %c0_64], %55 {strides = array<i32>} : memref<40x384xbf16, #tpu.memory_space<vmem>>, vector<4x384xbf16>,
    %c1_65 = arith.constant 1 : index
    %c0_66 = arith.constant 0 : index
    %c129_67 = arith.constant 129 : index
    %57 = vector.load %arg1[%c1_65, %c0_66, %c129_67] : memref<4x4x640xbf16, #tpu.memory_space<vmem>>, vector<1x4x384xbf16>
    %58 = vector.shape_cast %57 : vector<1x4x384xbf16> to vector<4x384xbf16>
    %c20_68 = arith.constant 20 : index
    %c0_69 = arith.constant 0 : index
    %59 = vector.load %arg7[%c20_68, %c0_69] : memref<40x384xbf16, #tpu.memory_space<vmem>>, vector<4x384xbf16>
    tpu.vector_store %arg7[%c20_68, %c0_69], %58 {strides = array<i32>} : memref<40x384xbf16, #tpu.memory_space<vmem>>, vector<4x384xbf16>,
    %c1_70 = arith.constant 1 : index
    %c0_71 = arith.constant 0 : index
    %c145_72 = arith.constant 145 : index
    %60 = vector.load %arg1[%c1_70, %c0_71, %c145_72] : memref<4x4x640xbf16, #tpu.memory_space<vmem>>, vector<1x4x384xbf16>
    %61 = vector.shape_cast %60 : vector<1x4x384xbf16> to vector<4x384xbf16>
    %c24_73 = arith.constant 24 : index
    %c0_74 = arith.constant 0 : index
    %62 = vector.load %arg7[%c24_73, %c0_74] : memref<40x384xbf16, #tpu.memory_space<vmem>>, vector<4x384xbf16>
    tpu.vector_store %arg7[%c24_73, %c0_74], %61 {strides = array<i32>} : memref<40x384xbf16, #tpu.memory_space<vmem>>, vector<4x384xbf16>,
    %c1_75 = arith.constant 1 : index
    %c0_76 = arith.constant 0 : index
    %c146_77 = arith.constant 146 : index
    %63 = vector.load %arg1[%c1_75, %c0_76, %c146_77] : memref<4x4x640xbf16, #tpu.memory_space<vmem>>, vector<1x4x384xbf16>
    %64 = vector.shape_cast %63 : vector<1x4x384xbf16> to vector<4x384xbf16>
    %c28_78 = arith.constant 28 : index
    %c0_79 = arith.constant 0 : index
    %65 = vector.load %arg7[%c28_78, %c0_79] : memref<40x384xbf16, #tpu.memory_space<vmem>>, vector<4x384xbf16>
    tpu.vector_store %arg7[%c28_78, %c0_79], %64 {strides = array<i32>} : memref<40x384xbf16, #tpu.memory_space<vmem>>, vector<4x384xbf16>,
    %c1_80 = arith.constant 1 : index
    %c0_81 = arith.constant 0 : index
    %c147_82 = arith.constant 147 : index
    %66 = vector.load %arg1[%c1_80, %c0_81, %c147_82] : memref<4x4x640xbf16, #tpu.memory_space<vmem>>, vector<1x4x384xbf16>
    %67 = vector.shape_cast %66 : vector<1x4x384xbf16> to vector<4x384xbf16>
    %c32_83 = arith.constant 32 : index
    %c0_84 = arith.constant 0 : index
    %68 = vector.load %arg7[%c32_83, %c0_84] : memref<40x384xbf16, #tpu.memory_space<vmem>>, vector<4x384xbf16>
    tpu.vector_store %arg7[%c32_83, %c0_84], %67 {strides = array<i32>} : memref<40x384xbf16, #tpu.memory_space<vmem>>, vector<4x384xbf16>,
    %c0_85 = arith.constant 0 : index
    %c0_86 = arith.constant 0 : index
    %69 = vector.load %arg2[%c0_85, %c0_86] : memref<32x40xbf16, #tpu.memory_space<vmem>>, vector<32x40xbf16>
    %c0_87 = arith.constant 0 : index
    %c0_88 = arith.constant 0 : index
    %70 = vector.load %arg7[%c0_87, %c0_88] : memref<40x384xbf16, #tpu.memory_space<vmem>>, vector<40x384xbf16>
    %cst_89 = arith.constant dense<0.000000e+00> : vector<32x384xf32>
    %71 = tpu.matmul %69, %70, %cst_89 {dimension_numbers = #tpu.dot_dimension_numbers<[1], [0], [0], [1], [0, 0, 1, 1], [], []>} : vector<32x40xbf16>, vector<40x384xbf16>, vector<32x384xf32> -> vector<32x384xf32>
    %cst_90 = arith.constant 0.000000e+00 : f32
    %72 = vector.broadcast %cst_90 : f32 to vector<32x384xf32>
    %73 = arith.maximumf %71, %72 : vector<32x384xf32>
    %cst_91 = arith.constant dense<0.000000e+00> : vector<32xf32>
    %74 = vector.multi_reduction <add>, %73, %cst_91 [1] : vector<32x384xf32> to vector<32xf32>
    %75 = vector.shape_cast %74 : vector<32xf32> to vector<32x1xf32>
    %c0_92 = arith.constant 0 : index
    %c0_93 = arith.constant 0 : index
    %76 = vector.load %arg4[%c0_92, %c0_93] : memref<32x1xf32, #tpu.memory_space<vmem>>, vector<32x1xf32>
    %77 = arith.mulf %75, %76 : vector<32x1xf32>
    %cst_94 = arith.constant dense<0.000000e+00> : vector<1xf32>
    %78 = vector.multi_reduction <add>, %77, %cst_94 [0] : vector<32x1xf32> to vector<1xf32>
    %79 = vector.shape_cast %78 : vector<1xf32> to vector<1x1xf32>
    %c0_95 = arith.constant 0 : index
    %c0_96 = arith.constant 0 : index
    %80 = vector.load %arg5[%c0_95, %c0_96] : memref<1x1xf32, #tpu.memory_space<vmem>>, vector<1x1xf32>
    %81 = arith.addf %79, %80 : vector<1x1xf32>
    %c2 = arith.constant 2 : index
    %c0_97 = arith.constant 0 : index
    %c109_98 = arith.constant 109 : index
    %82 = vector.load %arg1[%c2, %c0_97, %c109_98] : memref<4x4x640xbf16, #tpu.memory_space<vmem>>, vector<1x4x384xbf16>
    %83 = vector.shape_cast %82 : vector<1x4x384xbf16> to vector<4x384xbf16>
    %c0_99 = arith.constant 0 : index
    %c0_100 = arith.constant 0 : index
    %84 = vector.load %arg7[%c0_99, %c0_100] : memref<40x384xbf16, #tpu.memory_space<vmem>>, vector<4x384xbf16>
    tpu.vector_store %arg7[%c0_99, %c0_100], %83 {strides = array<i32>} : memref<40x384xbf16, #tpu.memory_space<vmem>>, vector<4x384xbf16>,
    %c2_101 = arith.constant 2 : index
    %c0_102 = arith.constant 0 : index
    %c110_103 = arith.constant 110 : index
    %85 = vector.load %arg1[%c2_101, %c0_102, %c110_103] : memref<4x4x640xbf16, #tpu.memory_space<vmem>>, vector<1x4x384xbf16>
    %86 = vector.shape_cast %85 : vector<1x4x384xbf16> to vector<4x384xbf16>
    %c4_104 = arith.constant 4 : index
    %c0_105 = arith.constant 0 : index
    %87 = vector.load %arg7[%c4_104, %c0_105] : memref<40x384xbf16, #tpu.memory_space<vmem>>, vector<4x384xbf16>
    tpu.vector_store %arg7[%c4_104, %c0_105], %86 {strides = array<i32>} : memref<40x384xbf16, #tpu.memory_space<vmem>>, vector<4x384xbf16>,
    %c2_106 = arith.constant 2 : index
    %c0_107 = arith.constant 0 : index
    %c111_108 = arith.constant 111 : index
    %88 = vector.load %arg1[%c2_106, %c0_107, %c111_108] : memref<4x4x640xbf16, #tpu.memory_space<vmem>>, vector<1x4x384xbf16>
    %89 = vector.shape_cast %88 : vector<1x4x384xbf16> to vector<4x384xbf16>
    %c8_109 = arith.constant 8 : index
    %c0_110 = arith.constant 0 : index
    %90 = vector.load %arg7[%c8_109, %c0_110] : memref<40x384xbf16, #tpu.memory_space<vmem>>, vector<4x384xbf16>
    tpu.vector_store %arg7[%c8_109, %c0_110], %89 {strides = array<i32>} : memref<40x384xbf16, #tpu.memory_space<vmem>>, vector<4x384xbf16>,
    %c2_111 = arith.constant 2 : index
    %c0_112 = arith.constant 0 : index
    %c127_113 = arith.constant 127 : index
    %91 = vector.load %arg1[%c2_111, %c0_112, %c127_113] : memref<4x4x640xbf16, #tpu.memory_space<vmem>>, vector<1x4x384xbf16>
    %92 = vector.shape_cast %91 : vector<1x4x384xbf16> to vector<4x384xbf16>
    %c12_114 = arith.constant 12 : index
    %c0_115 = arith.constant 0 : index
    %93 = vector.load %arg7[%c12_114, %c0_115] : memref<40x384xbf16, #tpu.memory_space<vmem>>, vector<4x384xbf16>
    tpu.vector_store %arg7[%c12_114, %c0_115], %92 {strides = array<i32>} : memref<40x384xbf16, #tpu.memory_space<vmem>>, vector<4x384xbf16>,
    %c2_116 = arith.constant 2 : index
    %c0_117 = arith.constant 0 : index
    %c128_118 = arith.constant 128 : index
    %94 = vector.load %arg1[%c2_116, %c0_117, %c128_118] : memref<4x4x640xbf16, #tpu.memory_space<vmem>>, vector<1x4x384xbf16>
    %95 = vector.shape_cast %94 : vector<1x4x384xbf16> to vector<4x384xbf16>
    %c16_119 = arith.constant 16 : index
    %c0_120 = arith.constant 0 : index
    %96 = vector.load %arg7[%c16_119, %c0_120] : memref<40x384xbf16, #tpu.memory_space<vmem>>, vector<4x384xbf16>
    tpu.vector_store %arg7[%c16_119, %c0_120], %95 {strides = array<i32>} : memref<40x384xbf16, #tpu.memory_space<vmem>>, vector<4x384xbf16>,
    %c2_121 = arith.constant 2 : index
    %c0_122 = arith.constant 0 : index
    %c129_123 = arith.constant 129 : index
    %97 = vector.load %arg1[%c2_121, %c0_122, %c129_123] : memref<4x4x640xbf16, #tpu.memory_space<vmem>>, vector<1x4x384xbf16>
    %98 = vector.shape_cast %97 : vector<1x4x384xbf16> to vector<4x384xbf16>
    %c20_124 = arith.constant 20 : index
    %c0_125 = arith.constant 0 : index
    %99 = vector.load %arg7[%c20_124, %c0_125] : memref<40x384xbf16, #tpu.memory_space<vmem>>, vector<4x384xbf16>
    tpu.vector_store %arg7[%c20_124, %c0_125], %98 {strides = array<i32>} : memref<40x384xbf16, #tpu.memory_space<vmem>>, vector<4x384xbf16>,
    %c2_126 = arith.constant 2 : index
    %c0_127 = arith.constant 0 : index
    %c145_128 = arith.constant 145 : index
    %100 = vector.load %arg1[%c2_126, %c0_127, %c145_128] : memref<4x4x640xbf16, #tpu.memory_space<vmem>>, vector<1x4x384xbf16>
    %101 = vector.shape_cast %100 : vector<1x4x384xbf16> to vector<4x384xbf16>
    %c24_129 = arith.constant 24 : index
    %c0_130 = arith.constant 0 : index
    %102 = vector.load %arg7[%c24_129, %c0_130] : memref<40x384xbf16, #tpu.memory_space<vmem>>, vector<4x384xbf16>
    tpu.vector_store %arg7[%c24_129, %c0_130], %101 {strides = array<i32>} : memref<40x384xbf16, #tpu.memory_space<vmem>>, vector<4x384xbf16>,
    %c2_131 = arith.constant 2 : index
    %c0_132 = arith.constant 0 : index
    %c146_133 = arith.constant 146 : index
    %103 = vector.load %arg1[%c2_131, %c0_132, %c146_133] : memref<4x4x640xbf16, #tpu.memory_space<vmem>>, vector<1x4x384xbf16>
    %104 = vector.shape_cast %103 : vector<1x4x384xbf16> to vector<4x384xbf16>
    %c28_134 = arith.constant 28 : index
    %c0_135 = arith.constant 0 : index
    %105 = vector.load %arg7[%c28_134, %c0_135] : memref<40x384xbf16, #tpu.memory_space<vmem>>, vector<4x384xbf16>
    tpu.vector_store %arg7[%c28_134, %c0_135], %104 {strides = array<i32>} : memref<40x384xbf16, #tpu.memory_space<vmem>>, vector<4x384xbf16>,
    %c2_136 = arith.constant 2 : index
    %c0_137 = arith.constant 0 : index
    %c147_138 = arith.constant 147 : index
    %106 = vector.load %arg1[%c2_136, %c0_137, %c147_138] : memref<4x4x640xbf16, #tpu.memory_space<vmem>>, vector<1x4x384xbf16>
    %107 = vector.shape_cast %106 : vector<1x4x384xbf16> to vector<4x384xbf16>
    %c32_139 = arith.constant 32 : index
    %c0_140 = arith.constant 0 : index
    %108 = vector.load %arg7[%c32_139, %c0_140] : memref<40x384xbf16, #tpu.memory_space<vmem>>, vector<4x384xbf16>
    tpu.vector_store %arg7[%c32_139, %c0_140], %107 {strides = array<i32>} : memref<40x384xbf16, #tpu.memory_space<vmem>>, vector<4x384xbf16>,
    %c0_141 = arith.constant 0 : index
    %c0_142 = arith.constant 0 : index
    %109 = vector.load %arg2[%c0_141, %c0_142] : memref<32x40xbf16, #tpu.memory_space<vmem>>, vector<32x40xbf16>
    %c0_143 = arith.constant 0 : index
    %c0_144 = arith.constant 0 : index
    %110 = vector.load %arg7[%c0_143, %c0_144] : memref<40x384xbf16, #tpu.memory_space<vmem>>, vector<40x384xbf16>
    %cst_145 = arith.constant dense<0.000000e+00> : vector<32x384xf32>
    %111 = tpu.matmul %109, %110, %cst_145 {dimension_numbers = #tpu.dot_dimension_numbers<[1], [0], [0], [1], [0, 0, 1, 1], [], []>} : vector<32x40xbf16>, vector<40x384xbf16>, vector<32x384xf32> -> vector<32x384xf32>
    %cst_146 = arith.constant 0.000000e+00 : f32
    %112 = vector.broadcast %cst_146 : f32 to vector<32x384xf32>
    %113 = arith.maximumf %111, %112 : vector<32x384xf32>
    %cst_147 = arith.constant dense<0.000000e+00> : vector<32xf32>
    %114 = vector.multi_reduction <add>, %113, %cst_147 [1] : vector<32x384xf32> to vector<32xf32>
    %115 = vector.shape_cast %114 : vector<32xf32> to vector<32x1xf32>
    %c0_148 = arith.constant 0 : index
    %c0_149 = arith.constant 0 : index
    %116 = vector.load %arg4[%c0_148, %c0_149] : memref<32x1xf32, #tpu.memory_space<vmem>>, vector<32x1xf32>
    %117 = arith.mulf %115, %116 : vector<32x1xf32>
    %cst_150 = arith.constant dense<0.000000e+00> : vector<1xf32>
    %118 = vector.multi_reduction <add>, %117, %cst_150 [0] : vector<32x1xf32> to vector<1xf32>
    %119 = vector.shape_cast %118 : vector<1xf32> to vector<1x1xf32>
    %c0_151 = arith.constant 0 : index
    %c0_152 = arith.constant 0 : index
    %120 = vector.load %arg5[%c0_151, %c0_152] : memref<1x1xf32, #tpu.memory_space<vmem>>, vector<1x1xf32>
    %121 = arith.addf %119, %120 : vector<1x1xf32>
    %c3 = arith.constant 3 : index
    %c0_153 = arith.constant 0 : index
    %c109_154 = arith.constant 109 : index
    %122 = vector.load %arg1[%c3, %c0_153, %c109_154] : memref<4x4x640xbf16, #tpu.memory_space<vmem>>, vector<1x4x384xbf16>
    %123 = vector.shape_cast %122 : vector<1x4x384xbf16> to vector<4x384xbf16>
    %c0_155 = arith.constant 0 : index
    %c0_156 = arith.constant 0 : index
    %124 = vector.load %arg7[%c0_155, %c0_156] : memref<40x384xbf16, #tpu.memory_space<vmem>>, vector<4x384xbf16>
    tpu.vector_store %arg7[%c0_155, %c0_156], %123 {strides = array<i32>} : memref<40x384xbf16, #tpu.memory_space<vmem>>, vector<4x384xbf16>,
    %c3_157 = arith.constant 3 : index
    %c0_158 = arith.constant 0 : index
    %c110_159 = arith.constant 110 : index
    %125 = vector.load %arg1[%c3_157, %c0_158, %c110_159] : memref<4x4x640xbf16, #tpu.memory_space<vmem>>, vector<1x4x384xbf16>
    %126 = vector.shape_cast %125 : vector<1x4x384xbf16> to vector<4x384xbf16>
    %c4_160 = arith.constant 4 : index
    %c0_161 = arith.constant 0 : index
    %127 = vector.load %arg7[%c4_160, %c0_161] : memref<40x384xbf16, #tpu.memory_space<vmem>>, vector<4x384xbf16>
    tpu.vector_store %arg7[%c4_160, %c0_161], %126 {strides = array<i32>} : memref<40x384xbf16, #tpu.memory_space<vmem>>, vector<4x384xbf16>,
    %c3_162 = arith.constant 3 : index
    %c0_163 = arith.constant 0 : index
    %c111_164 = arith.constant 111 : index
    %128 = vector.load %arg1[%c3_162, %c0_163, %c111_164] : memref<4x4x640xbf16, #tpu.memory_space<vmem>>, vector<1x4x384xbf16>
    %129 = vector.shape_cast %128 : vector<1x4x384xbf16> to vector<4x384xbf16>
    %c8_165 = arith.constant 8 : index
    %c0_166 = arith.constant 0 : index
    %130 = vector.load %arg7[%c8_165, %c0_166] : memref<40x384xbf16, #tpu.memory_space<vmem>>, vector<4x384xbf16>
    tpu.vector_store %arg7[%c8_165, %c0_166], %129 {strides = array<i32>} : memref<40x384xbf16, #tpu.memory_space<vmem>>, vector<4x384xbf16>,
    %c3_167 = arith.constant 3 : index
    %c0_168 = arith.constant 0 : index
    %c127_169 = arith.constant 127 : index
    %131 = vector.load %arg1[%c3_167, %c0_168, %c127_169] : memref<4x4x640xbf16, #tpu.memory_space<vmem>>, vector<1x4x384xbf16>
    %132 = vector.shape_cast %131 : vector<1x4x384xbf16> to vector<4x384xbf16>
    %c12_170 = arith.constant 12 : index
    %c0_171 = arith.constant 0 : index
    %133 = vector.load %arg7[%c12_170, %c0_171] : memref<40x384xbf16, #tpu.memory_space<vmem>>, vector<4x384xbf16>
    tpu.vector_store %arg7[%c12_170, %c0_171], %132 {strides = array<i32>} : memref<40x384xbf16, #tpu.memory_space<vmem>>, vector<4x384xbf16>,
    %c3_172 = arith.constant 3 : index
    %c0_173 = arith.constant 0 : index
    %c128_174 = arith.constant 128 : index
    %134 = vector.load %arg1[%c3_172, %c0_173, %c128_174] : memref<4x4x640xbf16, #tpu.memory_space<vmem>>, vector<1x4x384xbf16>
    %135 = vector.shape_cast %134 : vector<1x4x384xbf16> to vector<4x384xbf16>
    %c16_175 = arith.constant 16 : index
    %c0_176 = arith.constant 0 : index
    %136 = vector.load %arg7[%c16_175, %c0_176] : memref<40x384xbf16, #tpu.memory_space<vmem>>, vector<4x384xbf16>
    tpu.vector_store %arg7[%c16_175, %c0_176], %135 {strides = array<i32>} : memref<40x384xbf16, #tpu.memory_space<vmem>>, vector<4x384xbf16>,
    %c3_177 = arith.constant 3 : index
    %c0_178 = arith.constant 0 : index
    %c129_179 = arith.constant 129 : index
    %137 = vector.load %arg1[%c3_177, %c0_178, %c129_179] : memref<4x4x640xbf16, #tpu.memory_space<vmem>>, vector<1x4x384xbf16>
    %138 = vector.shape_cast %137 : vector<1x4x384xbf16> to vector<4x384xbf16>
    %c20_180 = arith.constant 20 : index
    %c0_181 = arith.constant 0 : index
    %139 = vector.load %arg7[%c20_180, %c0_181] : memref<40x384xbf16, #tpu.memory_space<vmem>>, vector<4x384xbf16>
    tpu.vector_store %arg7[%c20_180, %c0_181], %138 {strides = array<i32>} : memref<40x384xbf16, #tpu.memory_space<vmem>>, vector<4x384xbf16>,
    %c3_182 = arith.constant 3 : index
    %c0_183 = arith.constant 0 : index
    %c145_184 = arith.constant 145 : index
    %140 = vector.load %arg1[%c3_182, %c0_183, %c145_184] : memref<4x4x640xbf16, #tpu.memory_space<vmem>>, vector<1x4x384xbf16>
    %141 = vector.shape_cast %140 : vector<1x4x384xbf16> to vector<4x384xbf16>
    %c24_185 = arith.constant 24 : index
    %c0_186 = arith.constant 0 : index
    %142 = vector.load %arg7[%c24_185, %c0_186] : memref<40x384xbf16, #tpu.memory_space<vmem>>, vector<4x384xbf16>
    tpu.vector_store %arg7[%c24_185, %c0_186], %141 {strides = array<i32>} : memref<40x384xbf16, #tpu.memory_space<vmem>>, vector<4x384xbf16>,
    %c3_187 = arith.constant 3 : index
    %c0_188 = arith.constant 0 : index
    %c146_189 = arith.constant 146 : index
    %143 = vector.load %arg1[%c3_187, %c0_188, %c146_189] : memref<4x4x640xbf16, #tpu.memory_space<vmem>>, vector<1x4x384xbf16>
    %144 = vector.shape_cast %143 : vector<1x4x384xbf16> to vector<4x384xbf16>
    %c28_190 = arith.constant 28 : index
    %c0_191 = arith.constant 0 : index
    %145 = vector.load %arg7[%c28_190, %c0_191] : memref<40x384xbf16, #tpu.memory_space<vmem>>, vector<4x384xbf16>
    tpu.vector_store %arg7[%c28_190, %c0_191], %144 {strides = array<i32>} : memref<40x384xbf16, #tpu.memory_space<vmem>>, vector<4x384xbf16>,
    %c3_192 = arith.constant 3 : index
    %c0_193 = arith.constant 0 : index
    %c147_194 = arith.constant 147 : index
    %146 = vector.load %arg1[%c3_192, %c0_193, %c147_194] : memref<4x4x640xbf16, #tpu.memory_space<vmem>>, vector<1x4x384xbf16>
    %147 = vector.shape_cast %146 : vector<1x4x384xbf16> to vector<4x384xbf16>
    %c32_195 = arith.constant 32 : index
    %c0_196 = arith.constant 0 : index
    %148 = vector.load %arg7[%c32_195, %c0_196] : memref<40x384xbf16, #tpu.memory_space<vmem>>, vector<4x384xbf16>
    tpu.vector_store %arg7[%c32_195, %c0_196], %147 {strides = array<i32>} : memref<40x384xbf16, #tpu.memory_space<vmem>>, vector<4x384xbf16>,
    %c0_197 = arith.constant 0 : index
    %c0_198 = arith.constant 0 : index
    %149 = vector.load %arg2[%c0_197, %c0_198] : memref<32x40xbf16, #tpu.memory_space<vmem>>, vector<32x40xbf16>
    %c0_199 = arith.constant 0 : index
    %c0_200 = arith.constant 0 : index
    %150 = vector.load %arg7[%c0_199, %c0_200] : memref<40x384xbf16, #tpu.memory_space<vmem>>, vector<40x384xbf16>
    %cst_201 = arith.constant dense<0.000000e+00> : vector<32x384xf32>
    %151 = tpu.matmul %149, %150, %cst_201 {dimension_numbers = #tpu.dot_dimension_numbers<[1], [0], [0], [1], [0, 0, 1, 1], [], []>} : vector<32x40xbf16>, vector<40x384xbf16>, vector<32x384xf32> -> vector<32x384xf32>
    %cst_202 = arith.constant 0.000000e+00 : f32
    %152 = vector.broadcast %cst_202 : f32 to vector<32x384xf32>
    %153 = arith.maximumf %151, %152 : vector<32x384xf32>
    %cst_203 = arith.constant dense<0.000000e+00> : vector<32xf32>
    %154 = vector.multi_reduction <add>, %153, %cst_203 [1] : vector<32x384xf32> to vector<32xf32>
    %155 = vector.shape_cast %154 : vector<32xf32> to vector<32x1xf32>
    %c0_204 = arith.constant 0 : index
    %c0_205 = arith.constant 0 : index
    %156 = vector.load %arg4[%c0_204, %c0_205] : memref<32x1xf32, #tpu.memory_space<vmem>>, vector<32x1xf32>
    %157 = arith.mulf %155, %156 : vector<32x1xf32>
    %cst_206 = arith.constant dense<0.000000e+00> : vector<1xf32>
    %158 = vector.multi_reduction <add>, %157, %cst_206 [0] : vector<32x1xf32> to vector<1xf32>
    %159 = vector.shape_cast %158 : vector<1xf32> to vector<1x1xf32>
    %c0_207 = arith.constant 0 : index
    %c0_208 = arith.constant 0 : index
    %160 = vector.load %arg5[%c0_207, %c0_208] : memref<1x1xf32, #tpu.memory_space<vmem>>, vector<1x1xf32>
    %161 = arith.addf %159, %160 : vector<1x1xf32>
    %162 = tpu.concatenate %41, %81, %121, %161 in 0 : vector<1x1xf32>, vector<1x1xf32>, vector<1x1xf32>, vector<1x1xf32> -> vector<4x1xf32>
    %c0_209 = arith.constant 0 : index
    %c0_210 = arith.constant 0 : index
    %c0_211 = arith.constant 0 : index
    %163 = vector.load %arg6[%c0_209, %c0_210, %c0_211] : memref<1x4x1xf32, #tpu.memory_space<vmem>>, vector<1x4x1xf32>
    %164 = vector.shape_cast %163 : vector<1x4x1xf32> to vector<4x1xf32>
    %165 = vector.shape_cast %162 : vector<4x1xf32> to vector<1x4x1xf32>
    tpu.vector_store %arg6[%c0_209, %c0_210, %c0_211], %165 {strides = array<i32>} : memref<1x4x1xf32, #tpu.memory_space<vmem>>, vector<1x4x1xf32>,
    return
  }
  func.func @transform_0(%arg0: i32) -> (i32, i32, i32) {
    %c0_i32 = arith.constant 0 : i32
    %c0_i32_0 = arith.constant 0 : i32
    %c0_i32_1 = arith.constant 0 : i32
    return %arg0, %c0_i32, %c0_i32_0 : i32, i32, i32
  }
  func.func @transform_1(%arg0: i32) -> (i32, i32) {
    %c0_i32 = arith.constant 0 : i32
    %c0_i32_0 = arith.constant 0 : i32
    %c0_i32_1 = arith.constant 0 : i32
    return %c0_i32, %c0_i32_0 : i32, i32
  }
  func.func @transform_2(%arg0: i32) -> (i32, i32) {
    %c0_i32 = arith.constant 0 : i32
    %c0_i32_0 = arith.constant 0 : i32
    %c0_i32_1 = arith.constant 0 : i32
    return %c0_i32, %c0_i32_0 : i32, i32
  }
  func.func @transform_3(%arg0: i32) -> (i32, i32) {
    %c0_i32 = arith.constant 0 : i32
    %c0_i32_0 = arith.constant 0 : i32
    %c0_i32_1 = arith.constant 0 : i32
    return %c0_i32, %c0_i32_0 : i32, i32
  }
  func.func @transform_4(%arg0: i32) -> (i32, i32) {
    %c0_i32 = arith.constant 0 : i32
    %c0_i32_0 = arith.constant 0 : i32
    %c0_i32_1 = arith.constant 0 : i32
    return %c0_i32, %c0_i32_0 : i32, i32
  }
  func.func @transform_5(%arg0: i32) -> (i32, i32, i32) {
    %c0_i32 = arith.constant 0 : i32
    %c0_i32_0 = arith.constant 0 : i32
    %c0_i32_1 = arith.constant 0 : i32
    return %arg0, %c0_i32, %c0_i32_0 : i32, i32, i32
  }
}

</mosaic_0001>

<bundles_post_ra>
// kernel: tpu_custom_call.1
= control target key start
LH: loop header
LB: loop body
LE: loop exit
PB: predicated region body
PF: predicated region fallthrough
CT: control target
= control target key end

     0   :  { %s2596_s0 = inlined_call_operand.hbm [shape: bf16[8,4,640], index: 0, kind: input, shape index: {}]   ;;  %s2597_s1 = inlined_call_operand.vmem [shape: bf16[32,40], index: 1, kind: input, shape index: {}]   ;;  %s2598_s2 = inlined_call_operand.vmem [shape: bf16[4,384], index: 2, kind: input, shape index: {}]   ;;  %s2599_s3 = inlined_call_operand.vmem [shape: f32[32,1], index: 3, kind: input, shape index: {}]   ;;  %s2600_s4 = inlined_call_operand.<no memory space> [shape: f32[1,1], index: 4, kind: input, shape index: {}]   ;;  %s2601_s5 = inlined_call_operand.vmem [shape: f32[2,4,1], index: 5, kind: output, shape index: {}]  }
   0x1   :  { %v10_v0 = vstv %s2600_s4 }
   0x2   :  { %11 = vst [vmem:[#allocation3] sm:$0x1] %v10_v0 }
   0x3   :  { %12 = vsyncpa [#allocation5], 0 }
   0x4   :  { %14 = vsyncpa [#allocation5 + $0x1], 0  ;;  %s2179_s20 = smov 0   ;;  %s2181_s21 = smov 0  }
   0x5   :  { %s2183_s22 = smov 0   ;;  %s2185_s23 = smov 0  }
   0x6 LB: > { %s2198_s4 = sadd.s32 4294967295, %s2134_s23   ;;  %s2201_s24 = sadd.s32 1, %s2134_s23   ;;  %s2134_s23 = sphi %s2185_s23, %s2607_s23   ;;  %s2130_s22 = sphi %s2183_s22, %s2606_s22   ;;  %s2126_s21 = sphi %s2181_s21, %s2605_s21   ;;  %s2122_s20 = sphi %s2179_s20, %s2604_s20  }
   0x7   : > { %s24_s25 = ssub.s32 %s2134_s23, %s2201_s24  ;;  %s27_s26 = sadd.s32 1, %s2130_s22 }
   0x8   : > { %p25_p0 = scmp.eq.s32.totalorder %s24_s25, 0  ;;  %p34_p1 = scmp.ne.s32.totalorder %s2130_s22, %s2126_s21 }
   0x9   : > { %p35_p2 = scmp.eq.s32.totalorder %s2134_s23, 0  ;;  %p40_p3 = scmp.ne.s32.totalorder %s2126_s21, %s2122_s20 }
   0xa   : > { %s2211_s27 = scalar_select %p25_p0, %s2130_s22, %s27_s26  }
   0xb   : > { %p36_p4 = por %p35_p2, %p34_p1  ;;  %p41_p5 = scmp.eq.s32.totalorder %s2198_s4, 0 }
   0xc   : > { %p2027_p6 = scmp.lt.s32.totalorder %s2134_s23, 2  ;;  %s186_s29 = sand.u32 1, %s2130_s22  }
   0xd   : > { %p2215_p7 = por %p41_p5, %p40_p3  ;;  %s2018_s30 = smul.u32 40, %s186_s29 }
   0xe   : > { %s2019_s6 = smul.u32 40, %s2134_s23  ;;  %p2221_p8 = pnand %p2027_p6, %p36_p4 }
   0xf   : > { %s190_s11 = scalar_lea.vmem [#allocation4], %s2018_s30  ;;  %p1803_p9 = scmp.ge.s32.totalorder %s2134_s23, 1 }
  0x10   : > { %s196_s10 = scalar_lea.hbm %s2596_s0, %s2019_s6  ;;  %s199_s12 = sshll.u32 %s190_s11, 4  ;;  %s200_s12 = int_to_ptr.vmem [resolvable:$true] %s199_s12 }
  0x11   : > { %s197_s13 = sshll.u32 %s196_s10, 4  ;;  %s187_s14 = scalar_lea.sflag [#allocation5], %s186_s29  ;;  %s198_s13 = int_to_ptr.hbm [resolvable:$true] %s197_s13 }
  0x12   : > { %s2070_s15 = sshra.s32 %s198_s13, 4  ;;  %p2074_p11 = pneg %p2221_p8  ;;  %s2071_s15 = int_to_ptr.hbm [resolvable:$true] %s2070_s15 }
  0x13   : > { %s2072_s16 = scalar_lea.hbm %s2071_s15, 40  ;;  %s2077_s19 = scalar_lea.hbm %s2596_s0, 80 }
  0x14   : > { %p2073_p10 = scmp.ne.s32.totalorder %s2071_s15, %s2072_s16  ;;  %p2078_p0 = scmp.lt.s32.totalorder %s2071_s15, %s2596_s0 }
  0x15   : > { %p2079_p1 = scmp.lt.s32.totalorder %s2077_s19, %s2072_s16 }
  0x16   : > { %p2075_p12 = pnand %p2074_p11, %p2073_p10 }
  0x17   : > { %p2080_p2 = por %p2079_p1, %p2078_p0 }
  0x18   : > { %p2076_p13 = pneg %p2075_p12 }
  0x1a   : > { %p2081_p3 = pnand %p2080_p2, %p2076_p13 }
  0x1c   : > { %2084 = shalt.err (!%p2081_p3)
}
  0x1d   : > { %s2136_s26 = smov 160   ;;  %s2137_s29 = smov 10  }
  0x1e   : > { %2026 = dma.hbm_to_vmem [thread:$0]  (!%p2221_p8), %s198_s13, 640, %s200_s12, %s187_s14, %s2136_s26, %s2136_s26, %s2137_s29  }
  0x1f   : > { %p207_p4 = scmp.lt.s32.totalorder %s2134_s23, 3 }
  0x21   : > { %p208_p5 = pnand %p1803_p9, %p207_p4 }
  0x22   : > { %s213_s30 = sand.u32 (!%p208_p5), 1, %s2126_s21  }
  0x23   : > { %211 = sbr.rel (%p208_p5) target bundleno = 789 (0x315), region = 40  ;;  %s214_s8 = scalar_lea.sflag (!%p208_p5), [#allocation5], %s213_s30 }
  0x24   : > { %s2020_s6 = smul.u32 (!%p208_p5), 40, %s213_s30 }
  0x26   : > { %s2243_s9 = scalar_lea.vmem (!%p208_p5), [#allocation4], %s2020_s6 }
  0x28   : > { %2117 = dma.done.wait (%p2215_p7), %s214_s8, 640  }
  0x29   : > { %2119 = vsyncadd (%p2215_p7), %s214_s8, 4294966656  ;;  %v250_v1 = vld [vmem:[%s2598_s2] sm:$0x3f]  ;;  %s2138_s23 = smov 19   ;;  %s2139_s28 = smov 18   ;;  %v356_v14 = vld [vmem:[%s2243_s9 + $0x2] sm:$0xff] }
  0x2a   : > { %253 = vst [vmem:[#allocation1 + $0x1] ss:$2 sm:$0xff] %v250_v1  ;;  %v260_v2 = vld [vmem:[%s2243_s9] sm:$0xff]  ;;  %s2140_s7 = smov 17   ;;  %s2141_s12 = smov 1   ;;  %v1843_v23 = vld [vmem:[%s2243_s9 + $0xa] sm:$0xff] }
  0x2b   : > { %v347_v11 = vld [vmem:[%s2243_s9 + $0x2] sm:$0x3f]  ;;  %s2142_s13 = smov 127   ;;  %s2143_s14 = smov 111   ;;  %v1847_v32 = vld [vmem:[%s2243_s9 + $0xc] sm:$0x3f] }
  0x2c   : > { %s2144_s15 = smov 110   ;;  %s2145_s16 = smov 109   ;;  %v1848_v35 = vld [vmem:[%s2243_s9 + $0xc] sm:$0xff]  ;;  %v1890_v44 = vld [vmem:[%s2243_s9 + $0x14] sm:$0xff]  ;;  %vm275_vm0 = vcmask 154624   ;;  %vm273_vm1 = vcmask 1043456  }
  0x2d   : > { %vm318_vm2 = vcmask 138240   ;;  %v1894_v0 = vld [vmem:[%s2243_s9 + $0x16] sm:$0x3f]  ;;  %vm297_vm3 = vcmask 146432   ;;  %vm340_vm4 = vcmask 7168   ;;  %vm435_vm5 = vcmask 891904  }
  0x2e   : > { %vm371_vm6 = vcmask 1039360   ;;  %vm392_vm7 = vcmask 908288   ;;  %vm414_vm8 = vcmask 900096   ;;  %vm506_vm9 = vcmask 326656   ;;  %p245_p6 = scmp.lt.s32.totalorder %s2198_s4, 1 }
  0x2f   : > { %vm1724_vm10 = vcmask 1040384   ;;  %vm1726_vm11 = vcmask 1041408   ;;  %vm1728_vm12 = vcmask 1042432   ;;  %vm1730_vm13 = vcmask 3072  }
  0x30   : > { %s2609_s4 = smov (!%p245_p6, %s2198_s4), 1 }
  0x31   : > { %v254_v3 = vld.sshfl [vmem:[#allocation1] sm:$0xff pattern:$0x75643120]  ;;  %v255_v4 = vld.sshfl [vmem:[#allocation1 + $0x8] sm:$0xff pattern:$0x75643120] }
  0x32   : > { %262 = vst [vmem:[#allocation1] ss:$2 sm:$0xff] %v260_v2  ;;  %s1804_s20 = sshll.u32 %s2609_s4, 2 }
  0x33   : > { %258 = vst [vmem:[#allocation2 + $0x30] sm:$0xcc] %v254_v3  ;;  %s248_s29 = scalar_lea.vmem %s2601_s5, %s1804_s20 }
  0x34   : > { %259 = vst [vmem:[#allocation2 + $0x38] sm:$0xc] %v255_v4 }
  0x39   : > { %v263_v5 = vld.sshfl [vmem:[#allocation1] sm:$0xff pattern:$0x75643120]  ;;  %v265_v6 = vld.sshfl [vmem:[#allocation1 + $0x8] sm:$0xff pattern:$0x75643120] }
  0x3a   : > { %285 = vst [vmem:[#allocation1 + $0x1] ss:$2 sm:$0xff] %v260_v2  ;;  %267 = vrot.lane.b32.xlu1 %v263_v5, %s2138_s23  ;;  %269 = vrot.lane.b32.xlu2 %v265_v6, %s2138_s23 }
  0x41   : > { %v286_v7 = vld.sshfl [vmem:[#allocation1] sm:$0xff pattern:$0x75643120]  ;;  %v288_v8 = vld.sshfl [vmem:[#allocation1 + $0x8] sm:$0xff pattern:$0x75643120] }
  0x42   : > { %290 = vrot.lane.b32.xlu0 %v286_v7, %s2139_s28  ;;  %306 = vst [vmem:[#allocation1] ss:$2 sm:$0xff] %v260_v2  ;;  %292 = vrot.lane.b32.xlu1 %v288_v8, %s2139_s28 }
  0x49   : > { %v307_v9 = vld.sshfl [vmem:[#allocation1] sm:$0xff pattern:$0x75643120]  ;;  %v309_v10 = vld.sshfl [vmem:[#allocation1 + $0x8] sm:$0xff pattern:$0x75643120] }
  0x4a   : > { %328 = vst [vmem:[#allocation1 + $0x1] ss:$2 sm:$0xff] %v260_v2  ;;  %313 = vrot.lane.b32.xlu0 %v309_v10, %s2140_s7  ;;  %311 = vrot.lane.b32.xlu2 %v307_v9, %s2140_s7 }
  0x51   : > { %v329_v12 = vld.sshfl [vmem:[#allocation1] sm:$0xff pattern:$0x75643120]  ;;  %v331_v13 = vld.sshfl [vmem:[#allocation1 + $0x8] sm:$0xff pattern:$0x75643120] }
  0x52   : > { %349 = vst [vmem:[#allocation1] ss:$2 sm:$0xff] %v347_v11  ;;  %333 = vrot.lane.b32.xlu1 %v329_v12, %s2141_s12  ;;  %335 = vrot.lane.b32.xlu2 %v331_v13, %s2141_s12 }
  0x59   : > { %v350_v15 = vld.sshfl [vmem:[#allocation1] sm:$0xff pattern:$0x75643120]  ;;  %v351_v16 = vld.sshfl [vmem:[#allocation1 + $0x8] sm:$0xff pattern:$0x75643120] }
  0x5a   : > { %359 = vst [vmem:[#allocation1 + $0x1] ss:$2 sm:$0xff] %v356_v14 }
  0x5b   : > { %354 = vst [vmem:[#allocation2 + $0x18] sm:$0x33] %v350_v15 }
  0x5c   : > { %355 = vst [vmem:[#allocation2 + $0x20] sm:$0x3] %v351_v16 }
  0x61   : > { %v360_v17 = vld.sshfl [vmem:[#allocation1] sm:$0xff pattern:$0x75643120]  ;;  %v362_v18 = vld.sshfl [vmem:[#allocation1 + $0x8] sm:$0xff pattern:$0x75643120] }
  0x62   : > { %380 = vst [vmem:[#allocation1] ss:$2 sm:$0xff] %v356_v14  ;;  %364 = vrot.lane.b32.xlu1 %v360_v17, %s2142_s13 }
  0x69   : > { %v381_v19 = vld.sshfl [vmem:[#allocation1] sm:$0xff pattern:$0x75643120]  ;;  %v383_v20 = vld.sshfl [vmem:[#allocation1 + $0x8] sm:$0xff pattern:$0x75643120] }
  0x6a   : > { %402 = vst [vmem:[#allocation1 + $0x1] ss:$2 sm:$0xff] %v356_v14  ;;  %366 = vrot.lane.b32.xlu1 %v362_v18, %s2142_s13  ;;  %385 = vrot.lane.b32.xlu2 %v381_v19, %s2143_s14 }
  0x71   : > { %v403_v21 = vld.sshfl [vmem:[#allocation1] sm:$0xff pattern:$0x75643120]  ;;  %v405_v22 = vld.sshfl [vmem:[#allocation1 + $0x8] sm:$0xff pattern:$0x75643120] }
  0x72   : > { %407 = vrot.lane.b32.xlu0 %v403_v21, %s2144_s15  ;;  %423 = vst [vmem:[#allocation1] ss:$2 sm:$0xff] %v356_v14  ;;  %409 = vrot.lane.b32.xlu1 %v405_v22, %s2144_s15  ;;  %v1895_v14 = vld [vmem:[%s2243_s9 + $0x16] sm:$0xff] }
  0x73   : > { %387 = vrot.lane.b32.xlu2 %v383_v20, %s2143_s14 }
  0x79   : > { %v424_v24 = vld.sshfl [vmem:[#allocation1] sm:$0xff pattern:$0x75643120]  ;;  %v426_v25 = vld.sshfl [vmem:[#allocation1 + $0x8] sm:$0xff pattern:$0x75643120] }
  0x7a   : > { %428 = vrot.lane.b32.xlu0 %v424_v24, %s2145_s16  ;;  %635 = vst [vmem:[#allocation1] ss:$2 sm:$0xff] %v1843_v23 }
  0x81   : > { %v636_v26 = vld.sshfl [vmem:[#allocation1] sm:$0xff pattern:$0x75643120]  ;;  %v638_v27 = vld.sshfl [vmem:[#allocation1 + $0x8] sm:$0xff pattern:$0x75643120] }
  0x82   : > { %430 = vrot.lane.b32.xlu0 %v426_v25, %s2145_s16  ;;  %656 = vst [vmem:[#allocation1 + $0x1] ss:$2 sm:$0xff] %v1843_v23  ;;  %642 = vrot.lane.b32.xlu1 %v638_v27, %s2138_s23 }
  0x89   : > { %v659_v28 = vld.sshfl [vmem:[#allocation1 + $0x8] sm:$0xff pattern:$0x75643120]  ;;  %v657_v29 = vld.sshfl [vmem:[#allocation1] sm:$0xff pattern:$0x75643120] }
  0x8a   : > { %640 = vrot.lane.b32.xlu0 %v636_v26, %s2138_s23  ;;  %676 = vst [vmem:[#allocation1] ss:$2 sm:$0xff] %v1843_v23  ;;  %661 = vrot.lane.b32.xlu2 %v657_v29, %s2139_s28 }
  0x91   : > { %v677_v30 = vld.sshfl [vmem:[#allocation1] sm:$0xff pattern:$0x75643120]  ;;  %v679_v31 = vld.sshfl [vmem:[#allocation1 + $0x8] sm:$0xff pattern:$0x75643120] }
  0x92   : > { %663 = vrot.lane.b32.xlu0 %v659_v28, %s2139_s28  ;;  %697 = vst [vmem:[#allocation1 + $0x1] ss:$2 sm:$0xff] %v1843_v23  ;;  %681 = vrot.lane.b32.xlu1 %v677_v30, %s2140_s7 }
  0x93   : > { %683 = vrot.lane.b32.xlu2 %v679_v31, %s2140_s7 }
  0x94   : > { %v270_v55 = vpop.permute.xlu2 %269 }
  0x95   : > { %v272_v57 = vrot.slane %v270_v55, 4 }
  0x97   : > { %v277_v61 = vsel %vm275_vm0, %v270_v55, %v272_v57 }
  0x98   : > { %281 = vst [vmem:[#allocation2 + $0x8] sm:$0x3] %v277_v61 }
  0x99   : > { %v698_v33 = vld.sshfl [vmem:[#allocation1] sm:$0xff pattern:$0x75643120]  ;;  %v700_v34 = vld.sshfl [vmem:[#allocation1 + $0x8] sm:$0xff pattern:$0x75643120] }
  0x9a   : > { %702 = vrot.lane.b32.xlu0 %v698_v33, %s2141_s12  ;;  %717 = vst [vmem:[#allocation1] ss:$2 sm:$0xff] %v1847_v32  ;;  %704 = vrot.lane.b32.xlu1 %v700_v34, %s2141_s12 }
  0xa1   : > { %v2282_v36 = vld.sshfl [vmem:[#allocation1] sm:$0xff pattern:$0x75643120]  ;;  %v2284_v37 = vld.sshfl [vmem:[#allocation1 + $0x8] sm:$0xff pattern:$0x75643120] }
  0xa2   : > { %727 = vst [vmem:[#allocation1 + $0x1] ss:$2 sm:$0xff] %v1848_v35 }
  0xa4   : > { %v312_v5 = vpop.permute.xlu2 %311 }
  0xa5   : > { %v315_v7 = vrot.slane %v312_v5, 4 }
  0xa9   : > { %v728_v38 = vld.sshfl [vmem:[#allocation1] sm:$0xff pattern:$0x75643120]  ;;  %v730_v39 = vld.sshfl [vmem:[#allocation1 + $0x8] sm:$0xff pattern:$0x75643120] }
  0xaa   : > { %732 = vrot.lane.b32.xlu0 %v728_v38, %s2142_s13  ;;  %747 = vst [vmem:[#allocation1] ss:$2 sm:$0xff] %v1848_v35  ;;  %734 = vrot.lane.b32.xlu1 %v730_v39, %s2142_s13 }
  0xac   : > { %v268_v54 = vpop.permute.xlu1 %267  ;;  %v336_v18 = vpop.permute.xlu2 %335 }
  0xad   : > { %v271_v56 = vrot.slane %v268_v54, 4  ;;  %v338_v20 = vrot.slane %v336_v18, 4 }
  0xaf   : > { %v274_v60 = vsel %vm273_vm1, %v271_v56, %v272_v57  ;;  %v342_v23 = vsel %vm340_vm4, %v336_v18, %v338_v20  ;;  %v2351_v18 = vld [vmem:[%s2243_s9 + $0x1e] sm:$0xff] }
  0xb0   : > { %v276_v62 = vsel %vm275_vm0, %v268_v54, %v274_v60  ;;  %346 = vst [vmem:[#allocation2 + $0x14] sm:$0xc] %v342_v23 }
  0xb1   : > { %v750_v40 = vld.sshfl [vmem:[#allocation1 + $0x8] sm:$0xff pattern:$0x75643120]  ;;  %v748_v41 = vld.sshfl [vmem:[#allocation1] sm:$0xff pattern:$0x75643120] }
  0xb2   : > { %754 = vrot.lane.b32.xlu0 %v750_v40, %s2143_s14  ;;  %768 = vst [vmem:[#allocation1 + $0x1] ss:$2 sm:$0xff] %v1848_v35  ;;  %752 = vrot.lane.b32.xlu2 %v748_v41, %s2143_s14 }
  0xb3   : > { %280 = vst [vmem:[#allocation2] sm:$0x33] %v276_v62 }
  0xb4   : > { %v291_v51 = vpop.permute.xlu0 %290  ;;  %v293_v4 = vpop.permute.xlu1 %292 }
  0xb5   : > { %v294_v1 = vrot.slane %v291_v51, 4  ;;  %v295_v6 = vrot.slane %v293_v4, 4 }
  0xb7   : > { %v296_v9 = vsel %vm273_vm1, %v294_v1, %v295_v6  ;;  %v299_v10 = vsel %vm297_vm3, %v293_v4, %v295_v6 }
  0xb8   : > { %v298_v12 = vsel %vm297_vm3, %v291_v51, %v296_v9  ;;  %303 = vst [vmem:[#allocation2 + $0x8] sm:$0xc] %v299_v10 }
  0xb9   : > { %v769_v42 = vld.sshfl [vmem:[#allocation1] sm:$0xff pattern:$0x75643120]  ;;  %v771_v43 = vld.sshfl [vmem:[#allocation1 + $0x8] sm:$0xff pattern:$0x75643120] }
  0xba   : > { %788 = vst [vmem:[#allocation1] ss:$2 sm:$0xff] %v1848_v35  ;;  %773 = vrot.lane.b32.xlu1 %v769_v42, %s2144_s15  ;;  %775 = vrot.lane.b32.xlu2 %v771_v43, %s2144_s15 }
  0xbb   : > { %302 = vst [vmem:[#allocation2] sm:$0xcc] %v298_v12 }
  0xbc   : > { %v314_v58 = vpop.permute.xlu0 %313 }
  0xbd   : > { %v316_v59 = vrot.slane %v314_v58, 4 }
  0xbf   : > { %v320_v63 = vsel %vm318_vm2, %v314_v58, %v316_v59  ;;  %v317_v11 = vsel %vm273_vm1, %v315_v7, %v316_v59  ;;  %v1823_v10 = vld [vmem:[#allocation2 + $0x8] sm:$0xf] }
  0xc0   : > { %324 = vst [vmem:[#allocation2 + $0x14] sm:$0x3] %v320_v63  ;;  %v319_v13 = vsel %vm318_vm2, %v312_v5, %v317_v11 }
  0xc1   : > { %v789_v45 = vld.sshfl [vmem:[#allocation1] sm:$0xff pattern:$0x75643120]  ;;  %v791_v46 = vld.sshfl [vmem:[#allocation1 + $0x8] sm:$0xff pattern:$0x75643120] }
  0xc2   : > { %795 = vrot.lane.b32.xlu0 %v791_v46, %s2145_s16  ;;  %996 = vst [vmem:[#allocation1] ss:$2 sm:$0xff] %v1890_v44  ;;  %793 = vrot.lane.b32.xlu2 %v789_v45, %s2145_s16 }
  0xc3   : > { %323 = vst [vmem:[#allocation2 + $0xc] sm:$0x33] %v319_v13  ;;  %v1988_v13 = vld [vmem:[#allocation2 + $0x4] sm:$0xf] }
  0xc4   : > { %v334_v17 = vpop.permute.xlu1 %333  ;;  %v386_v28 = vpop.permute.xlu2 %385 }
  0xc5   : > { %v337_v19 = vrot.slane %v334_v17, 4  ;;  %v389_v35 = vrot.slane %v386_v28, 4 }
  0xc7   : > { %v339_v22 = vsel %vm273_vm1, %v337_v19, %v338_v20  ;;  %v1815_v20 = vld [vmem:[#allocation2] sm:$0xf] }
  0xc8   : > { %v341_v24 = vsel %vm340_vm4, %v334_v17, %v339_v22 }
  0xc9   : > { %v997_v47 = vld.sshfl [vmem:[#allocation1] sm:$0xff pattern:$0x75643120]  ;;  %v999_v48 = vld.sshfl [vmem:[#allocation1 + $0x8] sm:$0xff pattern:$0x75643120] }
  0xca   : > { %1017 = vst [vmem:[#allocation1 + $0x1] ss:$2 sm:$0xff] %v1890_v44  ;;  %1001 = vrot.lane.b32.xlu1 %v997_v47, %s2138_s23  ;;  %1003 = vrot.lane.b32.xlu2 %v999_v48, %s2138_s23 }
  0xcb   : > { %345 = vst [vmem:[#allocation2 + $0xc] sm:$0xcc] %v341_v24 }
  0xcd   : > { %v388_v42 = vpop.permute.xlu2 %387 }
  0xd1   : > { %v1018_v49 = vld.sshfl [vmem:[#allocation1] sm:$0xff pattern:$0x75643120]  ;;  %v1020_v50 = vld.sshfl [vmem:[#allocation1 + $0x8] sm:$0xff pattern:$0x75643120] }
  0xd2   : > { %1022 = vrot.lane.b32.xlu0 %v1018_v49, %s2139_s28  ;;  %1037 = vst [vmem:[#allocation1] ss:$2 sm:$0xff] %v1890_v44  ;;  %1024 = vrot.lane.b32.xlu1 %v1020_v50, %s2139_s28 }
  0xd4   : > { %v365_v27 = vpop.permute.xlu1 %364 }
  0xd5   : > { %v368_v34 = vrot.slane %v365_v27, 4 }
  0xd9   : > { %v1040_v52 = vld.sshfl [vmem:[#allocation1 + $0x8] sm:$0xff pattern:$0x75643120]  ;;  %v1038_v53 = vld.sshfl [vmem:[#allocation1] sm:$0xff pattern:$0x75643120] }
  0xda   : > { %1044 = vrot.lane.b32.xlu0 %v1040_v52, %s2140_s7  ;;  %1058 = vst [vmem:[#allocation1 + $0x1] ss:$2 sm:$0xff] %v1890_v44  ;;  %1042 = vrot.lane.b32.xlu2 %v1038_v53, %s2140_s7  ;;  %v390_v44 = vrot.slane %v388_v42, 4 }
  0xdc   : > { %v367_v41 = vpop.permute.xlu1 %366  ;;  %v391_v48 = vsel %vm273_vm1, %v389_v35, %v390_v44  ;;  %v394_v53 = vsel %vm392_vm7, %v388_v42, %v390_v44 }
  0xdd   : > { %v369_v43 = vrot.slane %v367_v41, 4  ;;  %v393_v50 = vsel %vm392_vm7, %v386_v28, %v391_v48  ;;  %398 = vst [vmem:[#allocation2 + $0x2c] sm:$0x3] %v394_v53 }
  0xde   : > { %397 = vst [vmem:[#allocation2 + $0x24] sm:$0x33] %v393_v50 }
  0xdf   : > { %v370_v46 = vsel %vm273_vm1, %v368_v34, %v369_v43  ;;  %v373_v47 = vsel %vm371_vm6, %v367_v41, %v369_v43 }
  0xe0   : > { %v372_v49 = vsel %vm371_vm6, %v365_v27, %v370_v46  ;;  %377 = vst [vmem:[#allocation2 + $0x20] sm:$0xc] %v373_v47 }
  0xe1   : > { %v1059_v2 = vld.sshfl [vmem:[#allocation1] sm:$0xff pattern:$0x75643120]  ;;  %v2306_v3 = vld.sshfl [vmem:[#allocation1 + $0x8] sm:$0xff pattern:$0x75643120] }
  0xe2   : > { %1078 = vst [vmem:[#allocation1] ss:$2 sm:$0xff] %v1894_v0  ;;  %1063 = vrot.lane.b32.xlu1 %v1059_v2, %s2141_s12 }
  0xe3   : > { %376 = vst [vmem:[#allocation2 + $0x18] sm:$0xcc] %v372_v49 }
  0xe4   : > { %v2309_v8 = vpop.permute.xlu0 %407  ;;  %v410_v57 = vpop.permute.xlu1 %409 }
  0xe5   : > { %v411_v52 = vrot.slane %v2309_v8, 4  ;;  %v662_v58 = vpop.permute.xlu2 %661  ;;  %v412_v61 = vrot.slane %v410_v57, 4 }
  0xe6   : > { %v665_v62 = vrot.slane %v662_v58, 4 }
  0xe7   : > { %v413_v4 = vsel %vm273_vm1, %v411_v52, %v412_v61  ;;  %v416_v5 = vsel %vm414_vm8, %v410_v57, %v412_v61 }
  0xe8   : > { %v415_v9 = vsel %vm414_vm8, %v2309_v8, %v413_v4  ;;  %420 = vst [vmem:[#allocation2 + $0x2c] sm:$0xc] %v416_v5 }
  0xe9   : > { %v2317_v15 = vld.sshfl [vmem:[#allocation1] sm:$0xff pattern:$0x75643120]  ;;  %v2319_v16 = vld.sshfl [vmem:[#allocation1 + $0x8] sm:$0xff pattern:$0x75643120] }
  0xea   : > { %1088 = vst [vmem:[#allocation1 + $0x1] ss:$2 sm:$0xff] %v1895_v14  ;;  %v1991_v27 = vld [vmem:[#allocation2 + $0x1c] sm:$0xf] }
  0xeb   : > { %419 = vst [vmem:[#allocation2 + $0x24] sm:$0xcc] %v415_v9 }
  0xec   : > { %v429_v21 = vpop.permute.xlu0 %428 }
  0xed   : > { %v432_v29 = vrot.slane %v429_v21, 4 }
  0xf1   : > { %v1089_v25 = vld.sshfl [vmem:[#allocation1] sm:$0xff pattern:$0x75643120]  ;;  %v1091_v26 = vld.sshfl [vmem:[#allocation1 + $0x8] sm:$0xff pattern:$0x75643120] }
  0xf2   : > { %1108 = vst [vmem:[#allocation1] ss:$2 sm:$0xff] %v1895_v14  ;;  %1093 = vrot.lane.b32.xlu1 %v1089_v25, %s2142_s13  ;;  %1095 = vrot.lane.b32.xlu2 %v1091_v26, %s2142_s13  ;;  %v684_v25 = vpop.permute.xlu2 %683  ;;  %v1827_v26 = vld [vmem:[#allocation2 + $0x18] sm:$0xf]  ;;  %v1829_v41 = vld [vmem:[#allocation2 + $0x24] sm:$0xf0] }
  0xf3   : > { %722 = vst [vmem:[#allocation2 + $0x18] sm:$0x33] %v2282_v36  ;;  %v1992_v36 = vld [vmem:[#allocation2 + $0x20] sm:$0xf0]  ;;  %v1832_v44 = vor.u32 %v1991_v27, %v1829_v41 }
  0xf4   : > { %v431_v30 = vpop.permute.xlu0 %430  ;;  %v643_v24 = vpop.permute.xlu1 %642  ;;  %v1828_v43 = vor.u32 %v1992_v36, %v1827_v26  ;;  %v2401_v27 = vld [vmem:[%s2243_s9 + $0x20] sm:$0xff] }
  0xf5   : > { %v433_v31 = vrot.slane %v431_v30, 4  ;;  %v645_v28 = vrot.slane %v643_v24, 4 }
  0xf7   : > { %v434_v32 = vsel %vm273_vm1, %v432_v29, %v433_v31  ;;  %v437_v33 = vsel %vm435_vm5, %v431_v30, %v433_v31  ;;  %v686_v29 = vrot.slane %v684_v25, 4  ;;  %v1835_v30 = vld [vmem:[#allocation2 + $0x20] sm:$0xf]  ;;  %v1990_v31 = vld [vmem:[#allocation2 + $0x10] sm:$0xf0]  ;;  %v648_v34 = vsel %vm275_vm0, %v643_v24, %v645_v28 }
  0xf8   : > { %v436_v38 = vsel %vm435_vm5, %v429_v21, %v434_v32  ;;  %441 = vst [vmem:[#allocation2 + $0x38] sm:$0x3] %v437_v33  ;;  %v1817_v32 = vld [vmem:[#allocation2 + $0xc] sm:$0xf0]  ;;  %v1824_v46 = vor.u32 %v1990_v31, %v1823_v10 }
  0xf9   : > { %v1109_v39 = vld.sshfl [vmem:[#allocation1] sm:$0xff pattern:$0x75643120]  ;;  %v1111_v40 = vld.sshfl [vmem:[#allocation1 + $0x8] sm:$0xff pattern:$0x75643120]  ;;  %v689_v35 = vsel %vm318_vm2, %v684_v25, %v686_v29  ;;  %v1820_v49 = vor.u32 %v1988_v13, %v1817_v32 }
  0xfa   : > { %1113 = vrot.lane.b32.xlu0 %v1109_v39, %s2143_s14  ;;  %1129 = vst [vmem:[#allocation1 + $0x1] ss:$2 sm:$0xff] %v1895_v14  ;;  %1115 = vrot.lane.b32.xlu1 %v1111_v40, %s2143_s14  ;;  %v1993_v39 = vld [vmem:[#allocation2 + $0x28] sm:$0xf0] }
  0xfb   : > { %440 = vst [vmem:[#allocation2 + $0x30] sm:$0x33] %v436_v38  ;;  %v1989_v38 = vld [vmem:[#allocation2 + $0x8] sm:$0xf0]  ;;  %v1836_v42 = vor.u32 %v1993_v39, %v1835_v30 }
  0xfc   : > { %v2331_v45 = vpop.permute.xlu0 %640  ;;  %723 = vst [vmem:[#allocation2 + $0x20] sm:$0x3] %v2284_v37  ;;  %v1816_v48 = vor.u32 %v1989_v38, %v1815_v20 }
  0xfd   : > { %v644_v19 = vrot.slane %v2331_v45, 4  ;;  %652 = vst [vmem:[#allocation2 + $0x8] sm:$0x3] %v648_v34 }
  0xfe   : > { %693 = vst [vmem:[#allocation2 + $0x14] sm:$0x3] %v689_v35 }
  0xff   : > { %v455_v51 = vld [vmem:[#allocation2 + $0x38] sm:$0xf]  ;;  %v646_v33 = vsel %vm273_vm1, %v644_v19, %v645_v28 }
 0x100   : > { %v490_v54 = vunpack.c.l.b16 %v455_v51  ;;  %v647_v40 = vsel %vm275_vm0, %v2331_v45, %v646_v33 }
 0x101   : > { %v1132_v55 = vld.sshfl [vmem:[#allocation1 + $0x8] sm:$0xff pattern:$0x75643120]  ;;  %v1130_v56 = vld.sshfl [vmem:[#allocation1] sm:$0xff pattern:$0x75643120] }
 0x102   : > { %1136 = vrot.lane.b32.xlu0 %v1132_v55, %s2144_s15  ;;  %1149 = vst [vmem:[#allocation1] ss:$2 sm:$0xff] %v1895_v14  ;;  %1134 = vrot.lane.b32.xlu2 %v1130_v56, %s2144_s15  ;;  %v454_v59 = vld [vmem:[#allocation2 + $0x30] sm:$0xff]  ;;  %v499_v60 = vpack.c.b16 %v490_v54, %v490_v54 }
 0x103   : > { %v488_v63 = vunpack.c.l.b16 %v454_v59  ;;  %v489_v0 = vunpack.c.h.b16 %v454_v59  ;;  %651 = vst [vmem:[#allocation2] sm:$0x33] %v647_v40 }
 0x104   : > { %v664_v1 = vpop.permute.xlu0 %663  ;;  %v521_v2 = vsel %vm273_vm1, %v499_v60, 0  ;;  %v682_v37 = vpop.permute.xlu1 %681 }
 0x105   : > { %v666_v6 = vrot.slane %v664_v1, 4  ;;  %v497_v7 = vpack.c.b16 %v488_v63, %v488_v63  ;;  %566 = vmatpush.bf16.msra.mxu2 %v521_v2  ;;  %v498_v11 = vpack.c.b16 %v489_v0, %v489_v0  ;;  %v685_v50 = vrot.slane %v682_v37, 4 }
 0x107   : > { %v669_v12 = vsel %vm297_vm3, %v664_v1, %v666_v6  ;;  %v667_v14 = vsel %vm273_vm1, %v665_v62, %v666_v6  ;;  %v515_v17 = vsel %vm273_vm1, %v497_v7, 0  ;;  %v518_v8 = vsel %vm273_vm1, %v498_v11, 0 }
 0x108   : > { %673 = vst [vmem:[#allocation2 + $0x8] sm:$0xc] %v669_v12  ;;  %v668_v21 = vsel %vm297_vm3, %v662_v58, %v667_v14  ;;  %528 = vmatpush.bf16.msra.mxu0 %v515_v17  ;;  %547 = vmatpush.bf16.msra.mxu1 %v518_v8  ;;  %v687_v53 = vsel %vm273_vm1, %v685_v50, %v686_v29 }
 0x109   : > { %v1152_v22 = vld.sshfl [vmem:[#allocation1 + $0x8] sm:$0xff pattern:$0x75643120]  ;;  %v1150_v23 = vld.sshfl [vmem:[#allocation1] sm:$0xff pattern:$0x75643120]  ;;  %567 = vmatpush.bf16.msra.mxu2 %v1836_v42  ;;  %v688_v54 = vsel %vm318_vm2, %v682_v37, %v687_v53 }
 0x10a   : > { %1156 = vrot.lane.b32.xlu0 %v1152_v22, %s2145_s16  ;;  %1154 = vrot.lane.b32.xlu2 %v1150_v23, %s2145_s16  ;;  %672 = vst [vmem:[#allocation2] sm:$0xcc] %v668_v21  ;;  %v1941_v21 = vld [vmem:[%s2243_s9 + $0x20] sm:$0x3f] }
 0x10b   : > { %1357 = vst [vmem:[#allocation1] ss:$2 sm:$0xff] %v2351_v18 }
 0x10c   : > { %v703_v47 = vpop.permute.xlu0 %702  ;;  %529 = vmatpush.bf16.msra.mxu0 %v1828_v43  ;;  %548 = vmatpush.bf16.msra.mxu1 %v1832_v44  ;;  %v753_v45 = vpop.permute.xlu2 %752  ;;  %692 = vst [vmem:[#allocation2 + $0xc] sm:$0x33] %v688_v54 }
 0x10d   : > { %568 = vmatpush.bf16.msra.mxu2 %v1824_v46  ;;  %v706_v55 = vrot.slane %v703_v47, 4  ;;  %v756_v4 = vrot.slane %v753_v45, 4 }
 0x110   : > { %530 = vmatpush.bf16.msra.mxu0 %v1816_v48  ;;  %549 = vmatpush.bf16.msra.mxu1 %v1820_v49 }
 0x112   : > { %1065 = vrot.lane.b32.xlu2 %v2306_v3, %s2141_s12  ;;  %v1360_v51 = vld.sshfl [vmem:[#allocation1 + $0x8] sm:$0xff pattern:$0x75643120]  ;;  %v1358_v52 = vld.sshfl [vmem:[#allocation1] sm:$0xff pattern:$0x75643120]  ;;  %v705_v3 = vpop.permute.xlu1 %704 }
 0x113   : > { %1364 = vrot.lane.b32.xlu0 %v1360_v51, %s2138_s23  ;;  %1378 = vst [vmem:[#allocation1 + $0x1] ss:$2 sm:$0xff] %v2351_v18  ;;  %v707_v57 = vrot.slane %v705_v3, 4 }
 0x114   : > { %v776_v56 = vpop.permute.xlu2 %775 }
 0x115   : > { %v778_v58 = vrot.slane %v776_v56, 4  ;;  %v708_v62 = vsel %vm273_vm1, %v706_v55, %v707_v57  ;;  %v710_v63 = vsel %vm340_vm4, %v705_v3, %v707_v57  ;;  %v1862_v57 = vld [vmem:[#allocation2] sm:$0xf] }
 0x116   : > { %v709_v1 = vsel %vm340_vm4, %v703_v47, %v708_v62  ;;  %714 = vst [vmem:[#allocation2 + $0x14] sm:$0xc] %v710_v63 }
 0x117   : > { %v781_v0 = vsel %vm414_vm8, %v776_v56, %v778_v58  ;;  %713 = vst [vmem:[#allocation2 + $0xc] sm:$0xcc] %v709_v1 }
 0x118   : > { %785 = vst [vmem:[#allocation2 + $0x2c] sm:$0xc] %v781_v0 }
 0x11a   : > { %1362 = vrot.lane.b32.xlu2 %v1358_v52, %s2138_s23  ;;  %v2373_v60 = vld.sshfl [vmem:[#allocation1] sm:$0xff pattern:$0x75643120]  ;;  %v2375_v61 = vld.sshfl [vmem:[#allocation1 + $0x8] sm:$0xff pattern:$0x75643120] }
 0x11b   : > { %1398 = vst [vmem:[#allocation1] ss:$2 sm:$0xff] %v2351_v18 }
 0x11c   : > { %v733_v59 = vpop.permute.xlu0 %732  ;;  %v735_v10 = vpop.permute.xlu1 %734 }
 0x11d   : > { %v736_v2 = vrot.slane %v733_v59, 4  ;;  %v737_v11 = vrot.slane %v735_v10, 4  ;;  %v794_v24 = vpop.permute.xlu2 %793 }
 0x11e   : > { %v797_v28 = vrot.slane %v794_v24, 4 }
 0x11f   : > { %v738_v17 = vsel %vm273_vm1, %v736_v2, %v737_v11  ;;  %v740_v19 = vsel %vm371_vm6, %v735_v10, %v737_v11  ;;  %v1870_v10 = vld [vmem:[#allocation2 + $0x8] sm:$0xf]  ;;  %v1864_v11 = vld [vmem:[#allocation2 + $0xc] sm:$0xf0] }
 0x120   : > { %v739_v20 = vsel %vm371_vm6, %v733_v59, %v738_v17  ;;  %744 = vst [vmem:[#allocation2 + $0x20] sm:$0xc] %v740_v19 }
 0x121   : > { %743 = vst [vmem:[#allocation2 + $0x18] sm:$0xcc] %v739_v20 }
 0x122   : > { %v2382_v5 = vld.sshfl [vmem:[#allocation1] sm:$0xff pattern:$0x75643120]  ;;  %v2384_v6 = vld.sshfl [vmem:[#allocation1 + $0x8] sm:$0xff pattern:$0x75643120] }
 0x123   : > { %1419 = vst [vmem:[#allocation1 + $0x1] ss:$2 sm:$0xff] %v2351_v18 }
 0x124   : > { %v755_v7 = vpop.permute.xlu0 %754 }
 0x125   : > { %v757_v9 = vrot.slane %v755_v7, 4  ;;  %v1004_v38 = vpop.permute.xlu2 %1003 }
 0x126   : > { %v1006_v47 = vrot.slane %v1004_v38, 4 }
 0x127   : > { %v758_v12 = vsel %vm273_vm1, %v756_v4, %v757_v9  ;;  %v760_v13 = vsel %vm392_vm7, %v755_v7, %v757_v9  ;;  %v1882_v2 = vld [vmem:[#allocation2 + $0x20] sm:$0xf]  ;;  %v1996_v7 = vld [vmem:[#allocation2 + $0x4] sm:$0xf] }
 0x128   : > { %v759_v14 = vsel %vm392_vm7, %v753_v45, %v758_v12  ;;  %764 = vst [vmem:[#allocation2 + $0x2c] sm:$0x3] %v760_v13  ;;  %v1874_v36 = vld [vmem:[#allocation2 + $0x18] sm:$0xf]  ;;  %v1999_v41 = vld [vmem:[#allocation2 + $0x1c] sm:$0xf]  ;;  %v1009_v56 = vsel %vm275_vm0, %v1004_v38, %v1006_v47  ;;  %v1867_v20 = vor.u32 %v1996_v7, %v1864_v11 }
 0x129   : > { %763 = vst [vmem:[#allocation2 + $0x24] sm:$0x33] %v759_v14  ;;  %v1998_v13 = vld [vmem:[#allocation2 + $0x10] sm:$0xf0] }
 0x12a   : > { %v2394_v18 = vld.sshfl [vmem:[#allocation1] sm:$0xff pattern:$0x75643120]  ;;  %v2396_v8 = vld.sshfl [vmem:[#allocation1 + $0x8] sm:$0xff pattern:$0x75643120] }
 0x12b   : > { %1439 = vst [vmem:[#allocation1] ss:$2 sm:$0xff] %v1941_v21 }
 0x12c   : > { %v774_v22 = vpop.permute.xlu1 %773  ;;  %1083 = vst [vmem:[#allocation2 + $0x18] sm:$0x33] %v2317_v15 }
 0x12d   : > { %v777_v23 = vrot.slane %v774_v22, 4  ;;  %1084 = vst [vmem:[#allocation2 + $0x20] sm:$0x3] %v2319_v16 }
 0x12e   : > { %1013 = vst [vmem:[#allocation2 + $0x8] sm:$0x3] %v1009_v56 }
 0x12f   : > { %v779_v25 = vsel %vm273_vm1, %v777_v23, %v778_v58  ;;  %v1997_v58 = vld [vmem:[#allocation2 + $0x8] sm:$0xf0] }
 0x130   : > { %v780_v26 = vsel %vm414_vm8, %v774_v22, %v779_v25  ;;  %v2001_v4 = vld [vmem:[#allocation2 + $0x28] sm:$0xf0]  ;;  %v1863_v17 = vor.u32 %v1997_v58, %v1862_v57  ;;  %v1871_v22 = vor.u32 %v1998_v13, %v1870_v10 }
 0x131   : > { %784 = vst [vmem:[#allocation2 + $0x24] sm:$0xcc] %v780_v26  ;;  %v1883_v9 = vor.u32 %v2001_v4, %v1882_v2  ;;  %v1995_v2 = vld [vmem:[%s2597_s1 + $0x8] sm:$0xff] }
 0x132   : > { %v2403_v29 = vld.sshfl [vmem:[#allocation1] sm:$0xff pattern:$0x75643120]  ;;  %v2405_v30 = vld.sshfl [vmem:[#allocation1 + $0x8] sm:$0xff pattern:$0x75643120] }
 0x133   : > { %1449 = vst [vmem:[#allocation1 + $0x1] ss:$2 sm:$0xff] %v2401_v27 }
 0x134   : > { %v796_v31 = vpop.permute.xlu0 %795  ;;  %v2415_v49 = vpop.permute.xlu2 %1042 }
 0x135   : > { %v798_v32 = vrot.slane %v796_v31, 4  ;;  %v1046_v21 = vrot.slane %v2415_v49, 4 }
 0x137   : > { %v801_v33 = vsel %vm435_vm5, %v796_v31, %v798_v32  ;;  %v799_v34 = vsel %vm273_vm1, %v797_v28, %v798_v32 }
 0x138   : > { %805 = vst [vmem:[#allocation2 + $0x38] sm:$0x3] %v801_v33  ;;  %v800_v35 = vsel %vm435_vm5, %v794_v24, %v799_v34  ;;  %v2000_v50 = vld [vmem:[#allocation2 + $0x20] sm:$0xf0]  ;;  %v1876_v51 = vld [vmem:[#allocation2 + $0x24] sm:$0xf0] }
 0x139   : > { %804 = vst [vmem:[#allocation2 + $0x30] sm:$0x33] %v800_v35  ;;  %v1875_v63 = vor.u32 %v2000_v50, %v1874_v36  ;;  %v1879_v0 = vor.u32 %v1999_v41, %v1876_v51 }
 0x13a   : > { %v1452_v39 = vld.sshfl [vmem:[#allocation1 + $0x8] sm:$0xff pattern:$0x75643120]  ;;  %v1450_v40 = vld.sshfl [vmem:[#allocation1] sm:$0xff pattern:$0x75643120] }
 0x13b   : > { %1456 = vrot.lane.b32.xlu0 %v1452_v39, %s2142_s13  ;;  %1454 = vrot.lane.b32.xlu2 %v1450_v40, %s2142_s13  ;;  %1469 = vst [vmem:[#allocation1] ss:$2 sm:$0xff] %v2401_v27 }
 0x13c   : > { %v1002_v62 = vpop.permute.xlu1 %1001 }
 0x13d   : > { %v1005_v1 = vrot.slane %v1002_v62, 4 }
 0x13f   : > { %v819_v43 = vld [vmem:[#allocation2 + $0x38] sm:$0xf]  ;;  %v1007_v12 = vsel %vm273_vm1, %v1005_v1, %v1006_v47 }
 0x140   : > { %v818_v42 = vld [vmem:[#allocation2 + $0x30] sm:$0xff]  ;;  %v854_v48 = vunpack.c.l.b16 %v819_v43  ;;  %v1008_v14 = vsel %vm275_vm0, %v1002_v62, %v1007_v12 }
 0x141   : > { %v852_v44 = vunpack.c.l.b16 %v818_v42  ;;  %v853_v46 = vunpack.c.h.b16 %v818_v42  ;;  %1012 = vst [vmem:[#allocation2] sm:$0x33] %v1008_v14 }
 0x142   : > { %v863_v52 = vpack.c.b16 %v854_v48, %v854_v48  ;;  %v1470_v53 = vld.sshfl [vmem:[#allocation1] sm:$0xff pattern:$0x75643120]  ;;  %v1472_v54 = vld.sshfl [vmem:[#allocation1 + $0x8] sm:$0xff pattern:$0x75643120] }
 0x143   : > { %v861_v37 = vpack.c.b16 %v852_v44, %v852_v44  ;;  %v862_v45 = vpack.c.b16 %v853_v46, %v853_v46  ;;  %1474 = vrot.lane.b32.xlu1 %v1470_v53, %s2143_s14  ;;  %1476 = vrot.lane.b32.xlu2 %v1472_v54, %s2143_s14  ;;  %1490 = vst [vmem:[#allocation1 + $0x1] ss:$2 sm:$0xff] %v2401_v27  ;;  %v1987_v44 = vld [vmem:[%s2597_s1 + $0x8] sm:$0xff]  ;;  %v1994_v48 = vld [vmem:[%s2597_s1] sm:$0xff] }
 0x144   : > { %v1023_v55 = vpop.permute.xlu0 %1022  ;;  %v883_v59 = vsel %vm273_vm1, %v863_v52, 0  ;;  %v1025_v31 = vpop.permute.xlu1 %1024 }
 0x145   : > { %v877_v15 = vsel %vm273_vm1, %v861_v37, 0  ;;  %v880_v3 = vsel %vm273_vm1, %v862_v45, 0  ;;  %928 = vmatpush.bf16.msrb.mxu1 %v883_v59  ;;  %v1026_v19 = vrot.slane %v1023_v55, 4  ;;  %v1027_v32 = vrot.slane %v1025_v31, 4 }
 0x146   : > { %890 = vmatpush.bf16.msra.mxu3 %v877_v15  ;;  %909 = vmatpush.bf16.msrb.mxu0 %v880_v3 }
 0x147   : > { %v1030_v40 = vsel %vm297_vm3, %v1025_v31, %v1027_v32 }
 0x148   : > { %1034 = vst [vmem:[#allocation2 + $0x8] sm:$0xc] %v1030_v40 }
 0x149   : > { %929 = vmatpush.bf16.msrb.mxu1 %v1883_v9 }
 0x14a   : > { %891 = vmatpush.bf16.msra.mxu3 %v1875_v63  ;;  %910 = vmatpush.bf16.msrb.mxu0 %v1879_v0  ;;  %v1493_v23 = vld.sshfl [vmem:[#allocation1 + $0x8] sm:$0xff pattern:$0x75643120]  ;;  %v1491_v16 = vld.sshfl [vmem:[#allocation1] sm:$0xff pattern:$0x75643120] }
 0x14b   : > { %1497 = vrot.lane.b32.xlu1 %v1493_v23, %s2144_s15  ;;  %1495 = vrot.lane.b32.xlu0 %v1491_v16, %s2144_s15  ;;  %1510 = vst [vmem:[#allocation1] ss:$2 sm:$0xff] %v2401_v27  ;;  %v1986_v27 = vld [vmem:[%s2597_s1] sm:$0xff] }
 0x14c   : > { %v1045_v24 = vpop.permute.xlu0 %1044  ;;  %v1096_v25 = vpop.permute.xlu2 %1095  ;;  %1385 = vrot.lane.b32.xlu2 %v2375_v61, %s2139_s28  ;;  %v1028_v61 = vsel %vm273_vm1, %v1026_v19, %v1027_v32  ;;  %1837 = vmatmul.msk.bf16.vlgmr.msra.gmra.mxu0 %vm506_vm9, %v1986_v27 }
 0x14d   : > { %v1047_v26 = vrot.slane %v1045_v24, 4  ;;  %v1098_v28 = vrot.slane %v1096_v25, 4  ;;  %930 = vmatpush.bf16.msrb.mxu1 %v1871_v22  ;;  %v1029_v39 = vsel %vm297_vm3, %v1023_v55, %v1028_v61  ;;  %1841 = vmatmul.msk.bf16.vlgmr.msra.gmra.mxu2 %vm506_vm9, %v1986_v27 }
 0x14e   : > { %892 = vmatpush.bf16.msra.mxu3 %v1863_v17  ;;  %911 = vmatpush.bf16.msrb.mxu0 %v1867_v20  ;;  %1033 = vst [vmem:[#allocation2] sm:$0xcc] %v1029_v39 }
 0x14f   : > { %v1048_v33 = vsel %vm273_vm1, %v1046_v21, %v1047_v26  ;;  %v1050_v34 = vsel %vm318_vm2, %v1045_v24, %v1047_v26  ;;  %v1101_v35 = vsel %vm371_vm6, %v1096_v25, %v1098_v28  ;;  %1839 = vmatmul.msk.bf16.vlgmr.msra.gmra.mxu1 %vm506_vm9, %v1986_v27  ;;  %v1917_v16 = vld [vmem:[#allocation2 + $0x8] sm:$0xf] }
 0x150   : > { %v1049_v38 = vsel %vm318_vm2, %v2415_v49, %v1048_v33  ;;  %1054 = vst [vmem:[#allocation2 + $0x14] sm:$0x3] %v1050_v34 }
 0x151   : > { %1053 = vst [vmem:[#allocation2 + $0xc] sm:$0x33] %v1049_v38  ;;  %1884 = vmatmul.msk.bf16.vlgmr.msra.gmra.mxu3 %vm506_vm9, %v1994_v48 }
 0x152   : > { %1105 = vst [vmem:[#allocation2 + $0x20] sm:$0xc] %v1101_v35  ;;  %v1513_v36 = vld.sshfl [vmem:[#allocation1 + $0x8] sm:$0xff pattern:$0x75643120] }
 0x153   : > { %v1511_v41 = vld.sshfl [vmem:[#allocation1] sm:$0xff pattern:$0x75643120]  ;;  %1517 = vrot.lane.b32.xlu1 %v1513_v36, %s2145_s16 }
 0x154   : > { %1515 = vrot.lane.b32.xlu0 %v1511_v41, %s2145_s16  ;;  %1424 = vrot.lane.b32.xlu2 %v2394_v18, %s2141_s12  ;;  %v1064_v42 = vpop.permute.xlu1 %1063 }
 0x155   : > { %v1067_v49 = vrot.slane %v1064_v42, 4  ;;  %v1909_v24 = vld [vmem:[#allocation2] sm:$0xf]  ;;  %v2004_v32 = vld [vmem:[#allocation2 + $0x4] sm:$0xf] }
 0x15b   : > { %1383 = vrot.lane.b32.xlu1 %v2373_v60, %s2139_s28 }
 0x15c   : > { %v1135_v43 = vpop.permute.xlu2 %1134  ;;  %1403 = vrot.lane.b32.xlu0 %v2382_v5, %s2140_s7  ;;  %1838 = vmatmul.msk.bf16.gmra.mxu0 %vm506_vm9, %v1987_v44 }
 0x15d   : > { %1842 = vmatmul.msk.bf16.gmra.mxu2 %vm506_vm9, %v1987_v44  ;;  %v1138_v57 = vrot.slane %v1135_v43, 4 }
 0x15f   : > { %1840 = vmatmul.msk.bf16.gmra.mxu1 %vm506_vm9, %v1987_v44 }
 0x161   : > { %1885 = vmatmul.msk.bf16.gmra.mxu3 %vm506_vm9, %v1995_v2 }
 0x163   : > { %1405 = vrot.lane.b32.xlu1 %v2384_v6, %s2140_s7 }
 0x164   : > { %v1155_v46 = vpop.permute.xlu2 %1154  ;;  %v1094_v18 = vpop.permute.xlu1 %1093  ;;  %1426 = vrot.lane.b32.xlu0 %v2396_v8, %s2141_s12  ;;  %v2471_v8 = vld [vmem:[#allocation2 + $0x20] sm:$0xf] }
 0x165   : > { %v1097_v60 = vrot.slane %v1094_v18, 4  ;;  %1445 = vst [vmem:[#allocation2 + $0x20] sm:$0x3] %v2405_v30  ;;  %v1158_v4 = vrot.slane %v1155_v46, 4 }
 0x167   : > { %v1099_v5 = vsel %vm273_vm1, %v1097_v60, %v1098_v28 }
 0x168   : > { %v1100_v47 = vsel %vm371_vm6, %v1094_v18, %v1099_v5 }
 0x169   : > { %1104 = vst [vmem:[#allocation2 + $0x18] sm:$0xcc] %v1100_v47 }
 0x16c   : > { %v1114_v37 = vpop.permute.xlu0 %1113  ;;  %v1066_v45 = vpop.permute.xlu2 %1065  ;;  %1886 = vmatmul.msk.bf16.vlgmr.msrb.gmra.mxu0 %vm506_vm9, %v1994_v48 }
 0x16d   : > { %v1117_v50 = vrot.slane %v1114_v37, 4  ;;  %v1068_v6 = vrot.slane %v1066_v45, 4  ;;  %v1116_v51 = vpop.permute.xlu1 %1115 }
 0x16e   : > { %v1118_v52 = vrot.slane %v1116_v51, 4 }
 0x16f   : > { %v1069_v53 = vsel %vm273_vm1, %v1067_v49, %v1068_v6  ;;  %v1071_v54 = vsel %vm340_vm4, %v1066_v45, %v1068_v6  ;;  %1888 = vmatmul.msk.bf16.vlgmr.msrb.gmra.mxu1 %vm506_vm9, %v1994_v48  ;;  %v2002_v48 = vld [vmem:[%s2597_s1] sm:$0xff] }
 0x170   : > { %v1070_v55 = vsel %vm340_vm4, %v1064_v42, %v1069_v53  ;;  %1075 = vst [vmem:[#allocation2 + $0x14] sm:$0xc] %v1071_v54  ;;  %v1119_v15 = vsel %vm273_vm1, %v1117_v50, %v1118_v52  ;;  %v1121_v3 = vsel %vm392_vm7, %v1116_v51, %v1118_v52  ;;  %v1921_v58 = vld [vmem:[#allocation2 + $0x18] sm:$0xf]  ;;  %v2007_v59 = vld [vmem:[#allocation2 + $0x1c] sm:$0xf] }
 0x171   : > { %1074 = vst [vmem:[#allocation2 + $0xc] sm:$0xcc] %v1070_v55  ;;  %v1120_v56 = vsel %vm392_vm7, %v1114_v37, %v1119_v15  ;;  %v2003_v52 = vld [vmem:[%s2597_s1 + $0x8] sm:$0xff] }
 0x172   : > { %1124 = vst [vmem:[#allocation2 + $0x24] sm:$0x33] %v1120_v56 }
 0x173   : > { %1125 = vst [vmem:[#allocation2 + $0x2c] sm:$0x3] %v1121_v3 }
 0x174   : > { %v1137_v30 = vpop.permute.xlu0 %1136  ;;  %1444 = vst [vmem:[#allocation2 + $0x18] sm:$0x33] %v2403_v29  ;;  %v1363_v12 = vpop.permute.xlu2 %1362 }
 0x175   : > { %v1139_v62 = vrot.slane %v1137_v30, 4  ;;  %v1366_v13 = vrot.slane %v1363_v12, 4 }
 0x177   : > { %v1140_v63 = vsel %vm273_vm1, %v1138_v57, %v1139_v62  ;;  %v1142_v0 = vsel %vm414_vm8, %v1137_v30, %v1139_v62 }
 0x178   : > { %v1141_v1 = vsel %vm414_vm8, %v1135_v43, %v1140_v63  ;;  %1146 = vst [vmem:[#allocation2 + $0x2c] sm:$0xc] %v1142_v0  ;;  %v2006_v43 = vld [vmem:[#allocation2 + $0x10] sm:$0xf0]  ;;  %v2005_v44 = vld [vmem:[#allocation2 + $0x8] sm:$0xf0] }
 0x179   : > { %1145 = vst [vmem:[#allocation2 + $0x24] sm:$0xcc] %v1141_v1  ;;  %v1918_v18 = vor.u32 %v2006_v43, %v1917_v16  ;;  %v1910_v60 = vor.u32 %v2005_v44, %v1909_v24 }
 0x17c   : > { %v1157_v7 = vpop.permute.xlu0 %1156  ;;  %1887 = vmatmul.msk.bf16.gmra.mxu0 %vm506_vm9, %v1995_v2 }
 0x17d   : > { %v1159_v9 = vrot.slane %v1157_v7, 4 }
 0x17f   : > { %v1160_v29 = vsel %vm273_vm1, %v1158_v4, %v1159_v9  ;;  %v1162_v10 = vsel %vm435_vm5, %v1157_v7, %v1159_v9  ;;  %1889 = vmatmul.msk.bf16.gmra.mxu1 %vm506_vm9, %v1995_v2  ;;  %v2009_v31 = vld [vmem:[#allocation2 + $0x28] sm:$0xf0] }
 0x180   : > { %v1161_v11 = vsel %vm435_vm5, %v1155_v46, %v1160_v29  ;;  %1166 = vst [vmem:[#allocation2 + $0x38] sm:$0x3] %v1162_v10  ;;  %v2008_v27 = vld [vmem:[#allocation2 + $0x20] sm:$0xf0]  ;;  %v1923_v38 = vld [vmem:[#allocation2 + $0x24] sm:$0xf0]  ;;  %v1930_v36 = vor.u32 %v2009_v31, %v2471_v8 }
 0x181   : > { %1165 = vst [vmem:[#allocation2 + $0x30] sm:$0x33] %v1161_v11  ;;  %v1922_v41 = vor.u32 %v2008_v27, %v1921_v58  ;;  %v1926_v42 = vor.u32 %v2007_v59, %v1923_v38  ;;  %v1911_v46 = vld [vmem:[#allocation2 + $0xc] sm:$0xf0] }
 0x182   : > { %v1914_v5 = vor.u32 %v2004_v32, %v1911_v46 }
 0x185   : > { %v1365_v14 = vpop.permute.xlu0 %1364 }
 0x186   : > { %v1367_v19 = vrot.slane %v1365_v14, 4 }
 0x187   : > { %v1180_v17 = vld [vmem:[#allocation2 + $0x38] sm:$0xf] }
 0x188   : > { %v1215_v20 = vunpack.c.l.b16 %v1180_v17  ;;  %v1179_v21 = vld [vmem:[#allocation2 + $0x30] sm:$0xff]  ;;  %v1368_v25 = vsel %vm273_vm1, %v1366_v13, %v1367_v19  ;;  %v1370_v26 = vsel %vm275_vm0, %v1365_v14, %v1367_v19 }
 0x189   : > { %v1213_v22 = vunpack.c.l.b16 %v1179_v21  ;;  %v1214_v23 = vunpack.c.h.b16 %v1179_v21  ;;  %v1369_v33 = vsel %vm275_vm0, %v1363_v12, %v1368_v25  ;;  %1374 = vst [vmem:[#allocation2 + $0x8] sm:$0x3] %v1370_v26 }
 0x18a   : > { %v1224_v28 = vpack.c.b16 %v1215_v20, %v1215_v20  ;;  %1373 = vst [vmem:[#allocation2] sm:$0x33] %v1369_v33 }
 0x18b   : > { %v1222_v34 = vpack.c.b16 %v1213_v22, %v1213_v22  ;;  %v1223_v35 = vpack.c.b16 %v1214_v23, %v1214_v23 }
 0x18c   : > { %v1244_v61 = vsel %vm273_vm1, %v1224_v28, 0 }
 0x18d   : > { %1289 = vmatpush.bf16.msra.mxu0 %v1244_v61  ;;  %v1238_v39 = vsel %vm273_vm1, %v1222_v34, 0  ;;  %v1241_v40 = vsel %vm273_vm1, %v1223_v35, 0 }
 0x18e   : > { %1251 = vmatpush.bf16.msrb.mxu2 %v1238_v39  ;;  %1270 = vmatpush.bf16.msrb.mxu3 %v1241_v40 }
 0x191   : > { %1290 = vmatpush.bf16.msra.mxu0 %v1930_v36 }
 0x192   : > { %1252 = vmatpush.bf16.msrb.mxu2 %v1922_v41  ;;  %1271 = vmatpush.bf16.msrb.mxu3 %v1926_v42 }
 0x195   : > { %1291 = vmatpush.bf16.msra.mxu0 %v1918_v18  ;;  %v1455_v47 = vpop.permute.xlu2 %1454 }
 0x196   : > { %1253 = vmatpush.bf16.msrb.mxu2 %v1910_v60  ;;  %1272 = vmatpush.bf16.msrb.mxu3 %v1914_v5  ;;  %v1458_v8 = vrot.slane %v1455_v47, 4 }
 0x198   : > { %1935 = vmatmul.msk.bf16.vlgmr.msra.gmra.mxu0 %vm506_vm9, %v2002_v48 }
 0x199   : > { %1931 = vmatmul.msk.bf16.vlgmr.msrb.gmra.mxu2 %vm506_vm9, %v2002_v48  ;;  %1933 = vmatmul.msk.bf16.vlgmr.msrb.gmra.mxu3 %vm506_vm9, %v2002_v48 }
 0x19d   : > { %v1477_v49 = vpop.permute.xlu2 %1476 }
 0x19e   : > { %v1479_v37 = vrot.slane %v1477_v49, 4 }
 0x1a0   : > { %v1482_v45 = vsel %vm392_vm7, %v1477_v49, %v1479_v37 }
 0x1a1   : > { %1486 = vst [vmem:[#allocation2 + $0x2c] sm:$0x3] %v1482_v45 }
 0x1a6   : > { %v1386_v50 = vpop.permute.xlu2 %1385 }
 0x1a7   : > { %v1388_v6 = vrot.slane %v1386_v50, 4 }
 0x1a8   : > { %1936 = vmatmul.msk.bf16.gmra.mxu0 %vm506_vm9, %v2003_v52 }
 0x1a9   : > { %v1391_v51 = vsel %vm297_vm3, %v1386_v50, %v1388_v6  ;;  %1932 = vmatmul.msk.bf16.gmra.mxu2 %vm506_vm9, %v2003_v52  ;;  %1934 = vmatmul.msk.bf16.gmra.mxu3 %vm506_vm9, %v2003_v52 }
 0x1aa   : > { %1395 = vst [vmem:[#allocation2 + $0x8] sm:$0xc] %v1391_v51 }
 0x1ad   : > { %v1457_v53 = vpop.permute.xlu0 %1456 }
 0x1ae   : > { %v1459_v54 = vrot.slane %v1457_v53, 4  ;;  %v1425_v16 = vpop.permute.xlu2 %1424 }
 0x1af   : > { %v1428_v33 = vrot.slane %v1425_v16, 4 }
 0x1b0   : > { %v1460_v55 = vsel %vm273_vm1, %v1458_v8, %v1459_v54  ;;  %v1462_v15 = vsel %vm371_vm6, %v1457_v53, %v1459_v54 }
 0x1b1   : > { %v1461_v3 = vsel %vm371_vm6, %v1455_v47, %v1460_v55  ;;  %1466 = vst [vmem:[#allocation2 + $0x20] sm:$0xc] %v1462_v15 }
 0x1b2   : > { %1465 = vst [vmem:[#allocation2 + $0x18] sm:$0xcc] %v1461_v3 }
 0x1b5   : > { %v1475_v56 = vpop.permute.xlu1 %1474 }
 0x1b6   : > { %v1478_v57 = vrot.slane %v1475_v56, 4 }
 0x1b8   : > { %v1480_v58 = vsel %vm273_vm1, %v1478_v57, %v1479_v37  ;;  %v1976_v36 = vld [vmem:[#allocation2 + $0x20] sm:$0xf] }
 0x1b9   : > { %v1481_v59 = vsel %vm392_vm7, %v1475_v56, %v1480_v58  ;;  %v1968_v5 = vld [vmem:[#allocation2 + $0x18] sm:$0xf]  ;;  %v2015_v50 = vld [vmem:[#allocation2 + $0x1c] sm:$0xf] }
 0x1ba   : > { %1485 = vst [vmem:[#allocation2 + $0x24] sm:$0x33] %v1481_v59 }
 0x1bd   : > { %v1498_v30 = vpop.permute.xlu1 %1497  ;;  %v1496_v62 = vpop.permute.xlu0 %1495 }
 0x1be   : > { %v1500_v63 = vrot.slane %v1498_v30, 4  ;;  %v1499_v0 = vrot.slane %v1496_v62, 4 }
 0x1c0   : > { %v1503_v1 = vsel %vm414_vm8, %v1498_v30, %v1500_v63  ;;  %v1501_v2 = vsel %vm273_vm1, %v1499_v0, %v1500_v63 }
 0x1c1   : > { %1507 = vst [vmem:[#allocation2 + $0x2c] sm:$0xc] %v1503_v1  ;;  %v1502_v4 = vsel %vm414_vm8, %v1496_v62, %v1501_v2 }
 0x1c2   : > { %1506 = vst [vmem:[#allocation2 + $0x24] sm:$0xcc] %v1502_v4 }
 0x1c5   : > { %v1518_v7 = vpop.permute.xlu1 %1517 }
 0x1c6   : > { %v1516_v9 = vpop.permute.xlu0 %1515  ;;  %v1520_v29 = vrot.slane %v1518_v7, 4 }
 0x1c7   : > { %v1519_v10 = vrot.slane %v1516_v9, 4 }
 0x1c8   : > { %v1523_v11 = vsel %vm435_vm5, %v1518_v7, %v1520_v29  ;;  %v2017_v27 = vld [vmem:[#allocation2 + $0x28] sm:$0xf0] }
 0x1c9   : > { %v1521_v12 = vsel %vm273_vm1, %v1519_v10, %v1520_v29  ;;  %1527 = vst [vmem:[#allocation2 + $0x38] sm:$0x3] %v1523_v11  ;;  %v532_v20 = vpop.f32.mrf.mxu0  ;;  %v2016_v41 = vld [vmem:[#allocation2 + $0x20] sm:$0xf0]  ;;  %v1970_v18 = vld [vmem:[#allocation2 + $0x24] sm:$0xf0]  ;;  %v1977_v60 = vor.u32 %v2017_v27, %v1976_v36 }
 0x1ca   : > { %v1522_v13 = vsel %vm435_vm5, %v1516_v9, %v1521_v12  ;;  %v1969_v45 = vor.u32 %v2016_v41, %v1968_v5  ;;  %v1973_v8 = vor.u32 %v2015_v50, %v1970_v18  ;;  %v580_v55 = vmax.f32 %v532_v20, 0.0  ;;  %v1964_v29 = vld [vmem:[#allocation2 + $0x8] sm:$0xf]  ;;  %v2011_v36 = vld [vmem:[%s2597_s1 + $0x8] sm:$0xff] }
 0x1cb   : > { %1526 = vst [vmem:[#allocation2 + $0x30] sm:$0x33] %v1522_v13 }
 0x1cc   : > { %v551_v26 = vpop.f32.mrf.mxu1 }
 0x1cd   : > { %v1384_v14 = vpop.permute.xlu1 %1383  ;;  %v581_v15 = vmax.f32 %v551_v26, 0.0 }
 0x1ce   : > { %v1404_v17 = vpop.permute.xlu0 %1403  ;;  %v1387_v19 = vrot.slane %v1384_v14, 4 }
 0x1cf   : > { %v1407_v38 = vrot.slane %v1404_v17, 4  ;;  %v592_v56 = vadd.f32 %v581_v15, %v580_v55 }
 0x1d0   : > { %v1389_v21 = vsel %vm273_vm1, %v1387_v19, %v1388_v6  ;;  %v1541_v22 = vld [vmem:[#allocation2 + $0x38] sm:$0xf]  ;;  %v570_v54 = vpop.f32.mrf.mxu2 }
 0x1d1   : > { %v1390_v23 = vsel %vm297_vm3, %v1384_v14, %v1389_v21  ;;  %v1576_v24 = vunpack.c.l.b16 %v1541_v22  ;;  %v534_v47 = vpop.f32.mrf.mxu0  ;;  %v582_v3 = vmax.f32 %v570_v54, 0.0  ;;  %v2010_v14 = vld [vmem:[%s2597_s1] sm:$0xff] }
 0x1d2   : > { %v1540_v25 = vld [vmem:[#allocation2 + $0x30] sm:$0xff]  ;;  %1394 = vst [vmem:[#allocation2] sm:$0xcc] %v1390_v23  ;;  %v583_v57 = vmax.f32 %v534_v47, 0.0 }
 0x1d3   : > { %v1574_v28 = vunpack.c.l.b16 %v1540_v25  ;;  %v1575_v31 = vunpack.c.h.b16 %v1540_v25  ;;  %v1585_v32 = vpack.c.b16 %v1576_v24, %v1576_v24  ;;  %v593_v59 = vadd.f32 %v592_v56, %v582_v3 }
 0x1d4   : > { %v553_v53 = vpop.f32.mrf.mxu1 }
 0x1d5   : > { %v1583_v34 = vpack.c.b16 %v1574_v28, %v1574_v28  ;;  %v1584_v35 = vpack.c.b16 %v1575_v31, %v1575_v31  ;;  %v1406_v61 = vpop.permute.xlu1 %1405  ;;  %v1605_v40 = vsel %vm273_vm1, %v1585_v32, 0  ;;  %v584_v58 = vmax.f32 %v553_v53, 0.0  ;;  %594 = vadd.xlane.f32.xlu1 %v593_v59  ;;  %v894_v28 = vpop.f32.mrf.mxu3 }
 0x1d6   : > { %v1427_v39 = vpop.permute.xlu0 %1426  ;;  %v1408_v42 = vrot.slane %v1406_v61, 4  ;;  %1650 = vmatpush.bf16.msra.mxu3 %v1605_v40  ;;  %v942_v32 = vmax.f32 %v894_v28, 0.0 }
 0x1d7   : > { %v1429_v43 = vrot.slane %v1427_v39, 4  ;;  %v1599_v44 = vsel %vm273_vm1, %v1583_v34, 0  ;;  %v1602_v46 = vsel %vm273_vm1, %v1584_v35, 0  ;;  %v596_v62 = vadd.f32 %v584_v58, %v583_v57 }
 0x1d8   : > { %1612 = vmatpush.bf16.msra.mxu1 %v1599_v44  ;;  %1631 = vmatpush.bf16.msra.mxu2 %v1602_v46  ;;  %v1409_v48 = vsel %vm273_vm1, %v1407_v38, %v1408_v42  ;;  %v1411_v49 = vsel %vm318_vm2, %v1406_v61, %v1408_v42  ;;  %v572_v2 = vpop.f32.mrf.mxu2 }
 0x1d9   : > { %v1430_v37 = vsel %vm273_vm1, %v1428_v33, %v1429_v43  ;;  %v1410_v6 = vsel %vm318_vm2, %v1404_v17, %v1409_v48  ;;  %1415 = vst [vmem:[#allocation2 + $0x14] sm:$0x3] %v1411_v49  ;;  %v1432_v52 = vsel %vm340_vm4, %v1427_v39, %v1429_v43  ;;  %v537_v30 = vpop.f32.mrf.mxu0  ;;  %v1956_v63 = vld [vmem:[#allocation2] sm:$0xf]  ;;  %v2012_v0 = vld [vmem:[#allocation2 + $0x4] sm:$0xf] }
 0x1da   : > { %v1431_v51 = vsel %vm340_vm4, %v1425_v16, %v1430_v37  ;;  %1414 = vst [vmem:[#allocation2 + $0xc] sm:$0x33] %v1410_v6  ;;  %1651 = vmatpush.bf16.msra.mxu3 %v1977_v60  ;;  %v585_v9 = vmax.f32 %v572_v2, 0.0  ;;  %v586_v17 = vmax.f32 %v537_v30, 0.0 }
 0x1db   : > { %1435 = vst [vmem:[#allocation2 + $0xc] sm:$0xcc] %v1431_v51 }
 0x1dc   : > { %1613 = vmatpush.bf16.msra.mxu1 %v1969_v45  ;;  %1632 = vmatpush.bf16.msra.mxu2 %v1973_v8  ;;  %1436 = vst [vmem:[#allocation2 + $0x14] sm:$0xc] %v1432_v52  ;;  %v556_v1 = vpop.f32.mrf.mxu1  ;;  %v597_v20 = vadd.f32 %v596_v62, %v585_v9 }
 0x1dd   : > { %v587_v19 = vmax.f32 %v556_v1, 0.0  ;;  %v896_v41 = vpop.f32.mrf.mxu3 }
 0x1de   : > { %598 = vadd.xlane.f32.xlu2 %v597_v20  ;;  %v945_v44 = vmax.f32 %v896_v41, 0.0 }
 0x1df   : > { %v600_v22 = vadd.f32 %v587_v19, %v586_v17 }
 0x1e0   : > { %v575_v16 = vpop.f32.mrf.mxu2 }
 0x1e1   : > { %v539_v21 = vpop.f32.mrf.mxu0  ;;  %v588_v24 = vmax.f32 %v575_v16, 0.0 }
 0x1e2   : > { %v2013_v4 = vld [vmem:[#allocation2 + $0x8] sm:$0xf0]  ;;  %v1958_v7 = vld [vmem:[#allocation2 + $0xc] sm:$0xf0]  ;;  %v589_v25 = vmax.f32 %v539_v21, 0.0 }
 0x1e3   : > { %v2014_v10 = vld [vmem:[#allocation2 + $0x10] sm:$0xf0]  ;;  %v1957_v11 = vor.u32 %v2013_v4, %v1956_v63  ;;  %v1961_v12 = vor.u32 %v2012_v0, %v1958_v7  ;;  %v601_v31 = vadd.f32 %v600_v22, %v588_v24 }
 0x1e4   : > { %v1965_v13 = vor.u32 %v2014_v10, %v1964_v29  ;;  %v558_v23 = vpop.f32.mrf.mxu1 }
 0x1e5   : > { %1614 = vmatpush.bf16.msra.mxu1 %v1957_v11  ;;  %1633 = vmatpush.bf16.msra.mxu2 %v1961_v12  ;;  %v590_v26 = vmax.f32 %v558_v23, 0.0  ;;  %v899_v48 = vpop.f32.mrf.mxu3 }
 0x1e6   : > { %1652 = vmatpush.bf16.msra.mxu3 %v1965_v13  ;;  %602 = vadd.xlane.f32.xlu0 %v601_v31  ;;  %v948_v37 = vmax.f32 %v899_v48, 0.0 }
 0x1e7   : > { %v604_v34 = vadd.f32 %v590_v26, %v589_v25 }
 0x1e8   : > { %1980 = vmatmul.msk.bf16.vlgmr.msra.gmra.mxu2 %vm506_vm9, %v2010_v14  ;;  %1978 = vmatmul.msk.bf16.vlgmr.msra.gmra.mxu1 %vm506_vm9, %v2010_v14  ;;  %v577_v38 = vpop.f32.mrf.mxu2 }
 0x1e9   : > { %1982 = vmatmul.msk.bf16.vlgmr.msra.gmra.mxu3 %vm506_vm9, %v2010_v14  ;;  %v913_v33 = vpop.f32.mrf.mxu0  ;;  %v591_v40 = vmax.f32 %v577_v38, 0.0 }
 0x1ea   : > { %v943_v35 = vmax.f32 %v913_v33, 0.0 }
 0x1eb   : > { %v605_v42 = vadd.f32 %v604_v34, %v591_v40 }
 0x1ec   : > { %v932_v27 = vpop.f32.mrf.mxu1  ;;  %v954_v61 = vadd.f32 %v943_v35, %v942_v32 }
 0x1ed   : > { %v944_v39 = vmax.f32 %v932_v27, 0.0  ;;  %606 = vadd.xlane.f32.xlu2 %v605_v42  ;;  %v901_v8 = vpop.f32.mrf.mxu3 }
 0x1ee   : > { %v951_v54 = vmax.f32 %v901_v8, 0.0 }
 0x1ef   : > { %v955_v43 = vadd.f32 %v954_v61, %v944_v39 }
 0x1f1   : > { %956 = vadd.xlane.f32.xlu1 %v955_v43  ;;  %v915_v46 = vpop.f32.mrf.mxu0 }
 0x1f2   : > { %v946_v18 = vmax.f32 %v915_v46, 0.0 }
 0x1f4   : > { %v934_v60 = vpop.f32.mrf.mxu1  ;;  %v958_v5 = vadd.f32 %v946_v18, %v945_v44 }
 0x1f5   : > { %v947_v47 = vmax.f32 %v934_v60, 0.0 }
 0x1f7   : > { %v959_v49 = vadd.f32 %v958_v5, %v947_v47 }
 0x1f8   : > { %1981 = vmatmul.msk.bf16.gmra.mxu2 %vm506_vm9, %v2011_v36  ;;  %1979 = vmatmul.msk.bf16.gmra.mxu1 %vm506_vm9, %v2011_v36 }
 0x1f9   : > { %1983 = vmatmul.msk.bf16.gmra.mxu3 %vm506_vm9, %v2011_v36  ;;  %960 = vadd.xlane.f32.xlu2 %v959_v49  ;;  %v918_v45 = vpop.f32.mrf.mxu0 }
 0x1fa   : > { %v949_v50 = vmax.f32 %v918_v45, 0.0 }
 0x1fc   : > { %v937_v6 = vpop.f32.mrf.mxu1  ;;  %v962_v51 = vadd.f32 %v949_v50, %v948_v37 }
 0x1fd   : > { %v950_v52 = vmax.f32 %v937_v6, 0.0 }
 0x1ff   : > { %v963_v53 = vadd.f32 %v962_v51, %v950_v52 }
 0x201   : > { %964 = vadd.xlane.f32.xlu0 %v963_v53  ;;  %v920_v55 = vpop.f32.mrf.mxu0 }
 0x202   : > { %v952_v15 = vmax.f32 %v920_v55, 0.0 }
 0x204   : > { %v939_v3 = vpop.f32.mrf.mxu1  ;;  %v966_v56 = vadd.f32 %v952_v15, %v951_v54 }
 0x205   : > { %v953_v57 = vmax.f32 %v939_v3, 0.0 }
 0x207   : > { %v967_v58 = vadd.f32 %v966_v56, %v953_v57 }
 0x209   : > { %968 = vadd.xlane.f32.xlu1 %v967_v58 }
 0x215   : > { %v1293_v59 = vpop.f32.mrf.mxu0 }
 0x216   : > { %v1305_v1 = vmax.f32 %v1293_v59, 0.0 }
 0x21c   : > { %v1255_v30 = vpop.f32.mrf.mxu2  ;;  %v1274_v62 = vpop.f32.mrf.mxu3 }
 0x21d   : > { %v1303_v63 = vmax.f32 %v1255_v30, 0.0  ;;  %v1304_v0 = vmax.f32 %v1274_v62, 0.0  ;;  %v1295_v7 = vpop.f32.mrf.mxu0 }
 0x21e   : > { %v1308_v12 = vmax.f32 %v1295_v7, 0.0 }
 0x21f   : > { %v1315_v2 = vadd.f32 %v1304_v0, %v1303_v63 }
 0x221   : > { %v1316_v4 = vadd.f32 %v1315_v2, %v1305_v1  ;;  %v609_v2 = vld [vmem:[%s2599_s3 + $0x8] sm:$0xff] }
 0x223   : > { %1317 = vadd.xlane.f32.xlu2 %v1316_v4  ;;  %v608_v4 = vld [vmem:[%s2599_s3] sm:$0xff] }
 0x224   : > { %v1257_v9 = vpop.f32.mrf.mxu2  ;;  %v1276_v29 = vpop.f32.mrf.mxu3 }
 0x225   : > { %v1306_v10 = vmax.f32 %v1257_v9, 0.0  ;;  %v1307_v11 = vmax.f32 %v1276_v29, 0.0  ;;  %v1298_v17 = vpop.f32.mrf.mxu0 }
 0x226   : > { %v1311_v23 = vmax.f32 %v1298_v17, 0.0 }
 0x227   : > { %v1319_v13 = vadd.f32 %v1307_v11, %v1306_v10  ;;  %v610_v10 = vld [vmem:[%s2599_s3 + $0x10] sm:$0xff] }
 0x229   : > { %v1320_v14 = vadd.f32 %v1319_v13, %v1308_v12 }
 0x22b   : > { %1321 = vadd.xlane.f32.xlu0 %v1320_v14 }
 0x22c   : > { %v1260_v19 = vpop.f32.mrf.mxu2  ;;  %v1279_v20 = vpop.f32.mrf.mxu3 }
 0x22d   : > { %v1309_v21 = vmax.f32 %v1260_v19, 0.0  ;;  %v1310_v22 = vmax.f32 %v1279_v20, 0.0  ;;  %v1300_v5 = vpop.f32.mrf.mxu0  ;;  %v611_v20 = vld [vmem:[%s2599_s3 + $0x18] sm:$0xff] }
 0x22e   : > { %v1314_v37 = vmax.f32 %v1300_v5, 0.0 }
 0x22f   : > { %v1323_v16 = vadd.f32 %v1310_v22, %v1309_v21 }
 0x231   : > { %v1324_v24 = vadd.f32 %v1323_v16, %v1311_v23 }
 0x233   : > { %1325 = vadd.xlane.f32.xlu0 %v1324_v24 }
 0x234   : > { %v1262_v25 = vpop.f32.mrf.mxu2  ;;  %v1281_v26 = vpop.f32.mrf.mxu3 }
 0x235   : > { %v1312_v46 = vmax.f32 %v1262_v25, 0.0  ;;  %v1313_v18 = vmax.f32 %v1281_v26, 0.0 }
 0x237   : > { %v1327_v49 = vadd.f32 %v1313_v18, %v1312_v46 }
 0x239   : > { %v1328_v52 = vadd.f32 %v1327_v49, %v1314_v37 }
 0x248   : > { %v595_v30 = vpop.xlane.xlu1 %594 }
 0x249   : > { %v612_v12 = vmul.f32 %v608_v4, %v595_v30 }
 0x24b   : > { %v617_v25 = vsel %vm340_vm4, %v612_v12, 0.0 }
 0x251   : > { %v599_v59 = vpop.xlane.xlu2 %598 }
 0x252   : > { %v613_v11 = vmul.f32 %v609_v2, %v599_v59 }
 0x254   : > { %v618_v24 = vsel %vm340_vm4, %v613_v11, 0.0 }
 0x259   : > { %v603_v62 = vpop.xlane.xlu0 %602 }
 0x25a   : > { %v614_v22 = vmul.f32 %v610_v10, %v603_v62 }
 0x260   : > { %v607_v63 = vpop.xlane.xlu2 %606 }
 0x264   : > { %v957_v0 = vpop.xlane.xlu1 %956 }
 0x265   : > { %v1616_v28 = vpop.f32.mrf.mxu1  ;;  %v974_v9 = vmul.f32 %v957_v0, %v608_v4 }
 0x266   : > { %v1664_v31 = vmax.f32 %v1616_v28, 0.0 }
 0x267   : > { %v978_v13 = vsel %vm340_vm4, %v974_v9, 0.0 }
 0x26b   : > { %v1635_v32 = vpop.f32.mrf.mxu2 }
 0x26c   : > { %v1665_v33 = vmax.f32 %v1635_v32, 0.0  ;;  %v1654_v34 = vpop.f32.mrf.mxu3  ;;  %v961_v7 = vpop.xlane.xlu2 %960 }
 0x26d   : > { %v1666_v35 = vmax.f32 %v1654_v34, 0.0  ;;  %v1618_v27 = vpop.f32.mrf.mxu1  ;;  %v975_v29 = vmul.f32 %v961_v7, %v609_v2  ;;  %v620_v34 = vsel %vm340_vm4, %v614_v22, 0.0 }
 0x26e   : > { %v1676_v38 = vadd.f32 %v1665_v33, %v1664_v31  ;;  %v1667_v40 = vmax.f32 %v1618_v27, 0.0  ;;  %v619_v31 = vadd.f32 %v618_v24, %v617_v25  ;;  %v615_v33 = vmul.f32 %v611_v20, %v607_v63 }
 0x26f   : > { %v979_v14 = vsel %vm340_vm4, %v975_v29, 0.0 }
 0x270   : > { %v1677_v61 = vadd.f32 %v1676_v38, %v1666_v35  ;;  %v980_v23 = vadd.f32 %v979_v14, %v978_v13 }
 0x272   : > { %1678 = vadd.xlane.f32.xlu1 %v1677_v61 }
 0x273   : > { %v1637_v39 = vpop.f32.mrf.mxu2 }
 0x274   : > { %v1668_v36 = vmax.f32 %v1637_v39, 0.0  ;;  %v1656_v41 = vpop.f32.mrf.mxu3  ;;  %v965_v1 = vpop.xlane.xlu0 %964  ;;  %v621_v39 = vadd.f32 %v620_v34, %v619_v31 }
 0x275   : > { %v1669_v43 = vmax.f32 %v1656_v41, 0.0  ;;  %v1621_v44 = vpop.f32.mrf.mxu1  ;;  %v976_v17 = vmul.f32 %v965_v1, %v610_v10 }
 0x276   : > { %v1680_v42 = vadd.f32 %v1668_v36, %v1667_v40  ;;  %v1670_v47 = vmax.f32 %v1621_v44, 0.0 }
 0x277   : > { %v981_v26 = vsel %vm340_vm4, %v976_v17, 0.0 }
 0x278   : > { %v1681_v60 = vadd.f32 %v1680_v42, %v1669_v43  ;;  %v982_v32 = vadd.f32 %v981_v26, %v980_v23  ;;  %v622_v42 = vsel %vm340_vm4, %v615_v33, 0.0  ;;  %v1352_v23 = vld [vmem:[#allocation3] sm:$0x1] }
 0x279   : > { %v623_v18 = vadd.f32 %v622_v42, %v621_v39  ;;  %v630_v26 = vld [vmem:[#allocation3] sm:$0x1] }
 0x27a   : > { %1682 = vadd.xlane.f32.xlu2 %v1681_v60 }
 0x27b   : > { %v1640_v48 = vpop.f32.mrf.mxu2 }
 0x27c   : > { %v1671_v45 = vmax.f32 %v1640_v48, 0.0  ;;  %v1659_v50 = vpop.f32.mrf.mxu3  ;;  %v969_v21 = vpop.xlane.xlu1 %968  ;;  %v624_v48 = vrot.slane %v623_v18, 4 }
 0x27d   : > { %v1672_v6 = vmax.f32 %v1659_v50, 0.0  ;;  %v1623_v53 = vpop.f32.mrf.mxu1  ;;  %v977_v28 = vmul.f32 %v969_v21, %v611_v20  ;;  %v991_v21 = vld [vmem:[#allocation3] sm:$0x1] }
 0x27e   : > { %v1684_v51 = vadd.f32 %v1671_v45, %v1670_v47  ;;  %v1673_v55 = vmax.f32 %v1623_v53, 0.0 }
 0x27f   : > { %v983_v35 = vsel %vm340_vm4, %v977_v28, 0.0 }
 0x280   : > { %v1685_v8 = vadd.f32 %v1684_v51, %v1672_v6  ;;  %v984_v40 = vadd.f32 %v983_v35, %v982_v32  ;;  %v1713_v32 = vld [vmem:[#allocation3] sm:$0x1] }
 0x282   : > { %1329 = vadd.xlane.f32.xlu2 %v1328_v52  ;;  %1686 = vadd.xlane.f32.xlu1 %v1685_v8  ;;  %v985_v60 = vrot.slane %v984_v40, 4 }
 0x283   : > { %v1642_v54 = vpop.f32.mrf.mxu2 }
 0x284   : > { %v1674_v15 = vmax.f32 %v1642_v54, 0.0  ;;  %v1661_v3 = vpop.f32.mrf.mxu3  ;;  %v986_v49 = vadd.f32 %v985_v60, %v984_v40  ;;  %v625_v54 = vadd.f32 %v624_v48, %v623_v18 }
 0x285   : > { %v1675_v57 = vmax.f32 %v1661_v3, 0.0 }
 0x286   : > { %v1688_v56 = vadd.f32 %v1674_v15, %v1673_v55  ;;  %v987_v55 = vrot.slane %v986_v49, 2  ;;  %v626_v59 = vrot.slane %v625_v54, 2 }
 0x288   : > { %v1689_v58 = vadd.f32 %v1688_v56, %v1675_v57  ;;  %v988_v30 = vadd.f32 %v987_v55, %v986_v49  ;;  %v627_v9 = vadd.f32 %v626_v59, %v625_v54 }
 0x28a   : > { %1690 = vadd.xlane.f32.xlu0 %v1689_v58  ;;  %v989_v29 = vrot.slane %v988_v30, 1  ;;  %v628_v14 = vrot.slane %v627_v9, 1 }
 0x28c   : > { %v990_v17 = vadd.f32 %v989_v29, %v988_v30 }
 0x28e   : > { %v992_v24 = vadd.f32 %v991_v21, %v990_v17 }
 0x290   : > { %v1716_v34 = vrot.slane %v992_v24, 7 }
 0x296   : > { %v1318_v16 = vpop.xlane.xlu2 %1317 }
 0x297   : > { %v1335_v38 = vmul.f32 %v1318_v16, %v608_v4 }
 0x299   : > { %v1339_v44 = vsel %vm340_vm4, %v1335_v38, 0.0 }
 0x29e   : > { %v1322_v19 = vpop.xlane.xlu0 %1321 }
 0x29f   : > { %v1336_v27 = vmul.f32 %v1322_v19, %v609_v2 }
 0x2a1   : > { %v1340_v43 = vsel %vm340_vm4, %v1336_v27, 0.0 }
 0x2a2   : > { %v1341_v5 = vadd.f32 %v1340_v43, %v1339_v44 }
 0x2a6   : > { %v1326_v61 = vpop.xlane.xlu0 %1325 }
 0x2a7   : > { %v1337_v46 = vmul.f32 %v1326_v61, %v610_v10 }
 0x2a9   : > { %v1342_v47 = vsel %vm340_vm4, %v1337_v46, 0.0 }
 0x2aa   : > { %v1343_v51 = vadd.f32 %v1342_v47, %v1341_v5 }
 0x2e5   : > { %v1679_v41 = vpop.xlane.xlu1 %1678 }
 0x2e6   : > { %v1696_v52 = vmul.f32 %v1679_v41, %v608_v4 }
 0x2e8   : > { %v1700_v57 = vsel %vm340_vm4, %v1696_v52, 0.0 }
 0x2ed   : > { %v1683_v36 = vpop.xlane.xlu2 %1682 }
 0x2ee   : > { %v1697_v50 = vmul.f32 %v1683_v36, %v609_v2 }
 0x2f0   : > { %v1701_v3 = vsel %vm340_vm4, %v1697_v50, 0.0 }
 0x2f1   : > { %v1702_v62 = vadd.f32 %v1701_v3, %v1700_v57 }
 0x2f5   : > { %v1330_v37 = vpop.xlane.xlu2 %1329  ;;  %v1687_v45 = vpop.xlane.xlu1 %1686 }
 0x2f6   : > { %v1338_v6 = vmul.f32 %v1330_v37, %v611_v20  ;;  %v1698_v53 = vmul.f32 %v1687_v45, %v610_v10 }
 0x2f8   : > { %v1344_v8 = vsel %vm340_vm4, %v1338_v6, 0.0  ;;  %v1703_v58 = vsel %vm340_vm4, %v1698_v53, 0.0 }
 0x2f9   : > { %v1345_v15 = vadd.f32 %v1344_v8, %v1343_v51  ;;  %v1704_v4 = vadd.f32 %v1703_v58, %v1702_v62 }
 0x2fb   : > { %v1346_v56 = vrot.slane %v1345_v15, 4 }
 0x2fd   : > { %v1347_v63 = vadd.f32 %v1346_v56, %v1345_v15  ;;  %v1691_v0 = vpop.xlane.xlu0 %1690 }
 0x2fe   : > { %v1699_v1 = vmul.f32 %v1691_v0, %v611_v20  ;;  %v629_v20 = vadd.f32 %v628_v14, %v627_v9 }
 0x2ff   : > { %v1348_v2 = vrot.slane %v1347_v63, 2 }
 0x300   : > { %v1705_v7 = vsel %vm340_vm4, %v1699_v1, 0.0  ;;  %v631_v33 = vadd.f32 %v630_v26, %v629_v20 }
 0x301   : > { %v1349_v10 = vadd.f32 %v1348_v2, %v1347_v63  ;;  %v1706_v11 = vadd.f32 %v1705_v7, %v1704_v4 }
 0x302   : > { %v1725_v61 = vsel %vm1724_vm10, %v631_v33, %v1716_v34 }
 0x303   : > { %v1350_v12 = vrot.slane %v1349_v10, 1  ;;  %v1707_v13 = vrot.slane %v1706_v11, 4 }
 0x305   : > { %v1708_v19 = vadd.f32 %v1707_v13, %v1706_v11  ;;  %v1351_v22 = vadd.f32 %v1350_v12, %v1349_v10 }
 0x307   : > { %v1709_v16 = vrot.slane %v1708_v19, 2  ;;  %v1353_v28 = vadd.f32 %v1352_v23, %v1351_v22 }
 0x309   : > { %v1710_v25 = vadd.f32 %v1709_v16, %v1708_v19  ;;  %v1719_v27 = vrot.slane %v1353_v28, 6 }
 0x30b   : > { %v1711_v31 = vrot.slane %v1710_v25, 1  ;;  %v1727_v40 = vsel %vm1726_vm11, %v1725_v61, %v1719_v27 }
 0x30d   : > { %v1712_v35 = vadd.f32 %v1711_v31, %v1710_v25 }
 0x30f   : > { %v1714_v38 = vadd.f32 %v1713_v32, %v1712_v35 }
 0x311   : > { %v1722_v39 = vrot.slane %v1714_v38, 5 }
 0x313   : > { %v1729_v36 = vsel %vm1728_vm12, %v1727_v40, %v1722_v39 }
 0x314   : > { %1731 = vst.msk [vmem:[%s248_s29] sm:$0xf] %vm1730_vm13, %v1729_v36 }
 0x315 PF: > { %p17_p7 = scmp.ge.s32.totalorder %s2201_s24, 4   ;;  %s2604_s20 = smov %s2126_s21 }
 0x316   : > { %s2605_s21 = smov %s2130_s22  ;;  %s2606_s22 = smov %s2211_s27 }
 0x317   : > { %s2607_s23 = smov %s2201_s24  ;;  %19 = sbr.rel (!%p17_p7) target bundleno = 6 (0x6), region = 100 }
 0x31c   :  { %1751 = vsyncpa [#allocation5], 1 }
 0x31d   :  { %1753 = vsyncpa [#allocation5 + $0x1], 1 }

</bundles_post_ra>
